<compile_context>
chip_gen: v7x
topology: tpu7x:2x2x1
jax: 0.10.0
libtpu: 0.0.40
codegen_flags: <defaults>
</compile_context>

<pallas_src>
import jax
import jax.numpy as jnp
from jax.experimental import pallas as pl
from jax.experimental.pallas import tpu as pltpu


# ----------------------------------------------------------------------------
# Pallas kernel: attention pooling + MLP head + cross-entropy, both heads
# unrolled inside one grid step (grid axis = batch tiles only).
# ----------------------------------------------------------------------------
def fused_attn_mlp_ce_kernel(emb_ref, vecs_ref, mask_ref, lab_ref,
                             w1_ref, b1_ref, w2_ref, b2_ref, nll_ref):
    n_heads = nll_ref.shape[0]                       # static (2)

    # shared encoder vectors: converted to f32 exactly once per tile
    vecs = vecs_ref[...].astype(jnp.float32)         # (TB, S, D)
    mask = mask_ref[...]                             # (TB, S) float32
    neg_big = jnp.float32(-1e30)

    nll_rows = []
    for h in range(n_heads):                         # static unroll over heads
        emb = emb_ref[h].astype(jnp.float32)         # (TB, S, D)  embed(inp)

        # weight = (embed(inp) * vecs).sum(-1); masked_fill(mask==0, -inf)
        # (-1e30 instead of -inf: fully-masked row -> uniform, not NaN)
        weight = jnp.sum(emb * vecs, axis=-1)                       # (TB, S)
        weight = jnp.where(mask > 0.5, weight, neg_big)

        # softmax over the sequence dim (dim=1 in torch)
        w_max = jnp.max(weight, axis=1, keepdims=True)
        w_exp = jnp.exp(weight - w_max)
        inv_den = pl.reciprocal(jnp.sum(w_exp, axis=1, keepdims=True),
                                approx=True)
        probs = w_exp * inv_den                                     # (TB, S)

        # pooled = (vecs * softmax(weight).unsqueeze(-1)).sum(1)
        pooled = jnp.sum(vecs * probs[..., None], axis=1)           # (TB, D)

        # 2-layer MLP head; weights are whole-array VMEM-resident blocks.
        w1 = w1_ref[h]                                              # (D, H)
        b1 = b1_ref[h]                                              # (1, H)
        w2 = w2_ref[h]                                              # (H, NB)
        b2 = b2_ref[h]                                              # (1, NB)
        hid = jnp.dot(pooled, w1, preferred_element_type=jnp.float32) + b1
        hid = jnp.maximum(hid, 0.0)
        logits = (jnp.dot(hid, w2, preferred_element_type=jnp.float32)
                  + b2)                                             # (TB, NB)

        # per-example cross entropy with int32 labels; one-hot built from an
        # in-kernel iota, logits never leave the kernel.
        lmax = jnp.max(logits, axis=1, keepdims=True)
        lse = jnp.log(jnp.sum(jnp.exp(logits - lmax), axis=1,
                              keepdims=True)) + lmax
        logp = logits - lse
        labels = lab_ref[h]                                         # (TB, 1)
        col = jax.lax.broadcasted_iota(jnp.int32, logp.shape, 1)
        onehot = (col == labels).astype(jnp.float32)
        nll_col = -jnp.sum(onehot * logp, axis=1, keepdims=True)    # (TB, 1)
        nll_rows.append(nll_col.T)                                  # (1, TB)

    # single lane-dense store for the whole (n_heads, TB) output block
    nll_ref[...] = jnp.concatenate(nll_rows, axis=0)


# ----------------------------------------------------------------------------
# Generation-aware tiling / VMEM planning
# ----------------------------------------------------------------------------
def _vmem_capacity_bytes():
    try:
        return int(pltpu.get_tpu_info().vmem_capacity_bytes)
    except Exception:
        return 64 * 1024 * 1024          # conservative (v7x per-TensorCore)


def _plan_tiling(B, S, D, H, NB, n_heads):
    """Pick the batch tile TB and a consistent scoped-VMEM limit.

    Accounts for: bf16 input streams (double-buffered), the in-kernel f32
    temporaries (vecs32 + emb32 + product), the resident weight blocks and a
    slack term.  TB is constrained so every BlockSpec stays (8,128)-legal:
    TB == B (full dim) or TB a multiple of 128 dividing B (lane-dense output).
    """
    cap = _vmem_capacity_bytes()
    budget = int(cap * 0.6)

    def tile_bytes(tb):
        streams_bf16 = (n_heads + 1) * tb * S * D * 2 * 2   # double-buffered
        f32_tmp = 3 * tb * S * D * 4                        # vecs32, emb32, prod
        small = 8 * tb * max(S, D, 128) * 4                 # weight/probs/pooled/...
        return streams_bf16 + f32_tmp + small

    weight_bytes = 2 * n_heads * (D * H + H + H * NB + NB) * 4

    cands = sorted({B} | {tb for tb in range(128, B, 128) if B % tb == 0})
    feasible = [tb for tb in cands if tile_bytes(tb) + weight_bytes <= budget]
    if not feasible:
        feasible = [min(cands)]
    tb = max(feasible)
    # prefer >=2 batch tiles (v7x dual TensorCore / deeper pipelining) when a
    # still-large split exists.
    split = [t for t in feasible if t < B]
    if tb == B and split and max(split) >= 128:
        tb = max(split)

    vmem_limit = max(32 * 1024 * 1024,
                     min(int(cap * 0.9),
                         tile_bytes(tb) + weight_bytes + (8 << 20)))
    return tb, vmem_limit


def fused_attn_head_losses(emb_both, all_vecs, mask, labels_both,
                           w1_both, b1_both, w2_both, b2_both,
                           *, batch_tile=None):
    """Both heads: self.attn(...) -> MLP -> per-example CE, one pallas_call.

    Returns (n_heads,) mean cross-entropy losses (F.cross_entropy 'mean')."""
    n_heads, B, S, D = emb_both.shape
    H = w1_both.shape[-1]
    NB = w2_both.shape[-1]

    TB, vmem_limit = _plan_tiling(B, S, D, H, NB, n_heads)
    if batch_tile is not None:
        assert B % batch_tile == 0 and (batch_tile == B or batch_tile % 128 == 0), \
            (B, batch_tile)
        TB = batch_tile
    assert B % TB == 0, (B, TB)
    grid = (B // TB,)

    flops = int(2 * n_heads * B * (2 * S * D + D * H + H * NB))
    transcendentals = int(n_heads * B * (S + NB + 2))
    bytes_accessed = int((n_heads + 1) * B * S * D * 2      # bf16 streams
                         + B * S * 4                        # mask
                         + n_heads * (D * H + H * NB + H + NB) * 4
                         + n_heads * B * (4 + 4))           # labels + nll

    nll = pl.pallas_call(
        fused_attn_mlp_ce_kernel,
        grid=grid,
        in_specs=[
            # both heads' token embeddings for this batch tile
            pl.BlockSpec((n_heads, TB, S, D), lambda bi: (0, bi, 0, 0)),
            # encoder vectors, shared by both heads (one DMA + one upcast/tile)
            pl.BlockSpec((TB, S, D), lambda bi: (bi, 0, 0)),
            pl.BlockSpec((TB, S), lambda bi: (bi, 0)),
            # int32 labels per head, (TB, 1) column
            pl.BlockSpec((n_heads, TB, 1), lambda bi: (0, bi, 0)),
            # both heads' MLP weights: whole-array blocks, VMEM-resident
            pl.BlockSpec((n_heads, D, H), lambda bi: (0, 0, 0)),
            pl.BlockSpec((n_heads, 1, H), lambda bi: (0, 0, 0)),
            pl.BlockSpec((n_heads, H, NB), lambda bi: (0, 0, 0)),
            pl.BlockSpec((n_heads, 1, NB), lambda bi: (0, 0, 0)),
        ],
        # lane-dense per-example NLL: batch tile on the lane axis
        out_specs=pl.BlockSpec((n_heads, TB), lambda bi: (0, bi)),
        out_shape=jax.ShapeDtypeStruct((n_heads, B), jnp.float32),
        compiler_params=pltpu.CompilerParams(
            dimension_semantics=("parallel",),
            vmem_limit_bytes=vmem_limit),
        cost_estimate=pl.CostEstimate(flops=flops,
                                      transcendentals=transcendentals,
                                      bytes_accessed=bytes_accessed),
    )(emb_both, all_vecs, mask, labels_both, w1_both, b1_both, w2_both, b2_both)

    return jnp.mean(nll, axis=1)                     # (n_heads,)


# ----------------------------------------------------------------------------
# Glue: quantize_pos, encoder stand-in, parameter init, full forward
# ----------------------------------------------------------------------------
def quantize_pos(ids, ids_mask, bins):
    # np.digitize(ids / ids_mask.sum(1), bins) - 1
    return jnp.digitize(ids / ids_mask.sum(axis=1), bins) - 1


def encode_get_vecs(word_embed, sent, mask):
    # TODO(synk): the original `encoders` module is external; this is a
    # word-averaging encoder of matching shapes (ensize == embed_dim branch).
    all_vecs = word_embed[sent]                                   # (B, S, D)
    denom = jnp.maximum(mask.sum(axis=1, keepdims=True), 1.0)
    sent_vec = (all_vecs * mask[..., None]).sum(axis=1) / denom
    return sent_vec, all_vecs


def init_params(key, vocab, D, H, NB):
    ks = jax.random.split(key, 8)
    s = 0.1
    return {
        "word_embed": s * jax.random.normal(ks[0], (vocab, D), jnp.float32),
        # pre-stacked position-embedding tables: [0]=sent_embed, [1]=para_embed
        "pos_embed": s * jax.random.normal(ks[1], (2, vocab, D), jnp.float32),
        # pre-stacked MLP heads: [0]=sent_id_pred, [1]=para_id_pred
        "head_w1": s * jax.random.normal(ks[2], (2, D, H), jnp.float32),
        "head_b1": jnp.zeros((2, 1, H), jnp.float32),
        "head_w2": s * jax.random.normal(ks[3], (2, H, NB), jnp.float32),
        "head_b2": jnp.zeros((2, 1, NB), jnp.float32),
    }


def forward(params, cfg, sent, mask, tgt, tgt_mask, tgt2, tgt_mask2,
            doc_id, para_id, pmask, sent_id, smask):
    nb = cfg["nb"]
    bins = jnp.arange(nb, dtype=jnp.float32) / nb

    para_q = quantize_pos(para_id.astype(jnp.float32), pmask, bins)
    sent_q = quantize_pos(sent_id.astype(jnp.float32), smask, bins)

    sent_vec, all_vecs = encode_get_vecs(params["word_embed"], sent, mask)

    # TODO(synk): prev_decode / next_decode reconstruction losses come from the
    # external `decoders` module and cannot be reproduced here (sent_vec would
    # feed them); they are zeroed, matching shapes of the original outputs.
    logloss1 = jnp.float32(0.0)
    logloss2 = jnp.float32(0.0)
    logloss = logloss1 + logloss2

    # Fused sent-position + para-position heads (sratio / pratio branches).
    # Head 0 = sent, head 1 = para.
    # TODO(synk): model_utils.get_mlp dropout (dp) is omitted (deterministic head).
    # single fused bf16 gather from the pre-stacked (2, vocab, D) table
    emb_both = params["pos_embed"].astype(jnp.bfloat16)[:, sent]  # (2, B, S, D)
    labels_both = jnp.stack([sent_q, para_q], axis=0).astype(jnp.int32)[..., None]

    losses = fused_attn_head_losses(
        emb_both, all_vecs.astype(jnp.bfloat16), mask.astype(jnp.float32),
        labels_both, params["head_w1"], params["head_b1"],
        params["head_w2"], params["head_b2"],
        batch_tile=cfg.get("batch_tile"))
    sent_id_loss, para_id_loss = losses[0], losses[1]

    loss = (cfg["lratio"] * logloss
            + cfg["sratio"] * sent_id_loss
            + cfg["pratio"] * para_id_loss)
    return loss, logloss1, logloss2, sent_id_loss, para_id_loss


if __name__ == "__main__":
    # small shapes consistent with the module
    B, S = 16, 8           # batch, sequence length
    vocab = 64
    D = 32                 # embed_dim == ensize (non-RNN encoder branch)
    H = 16                 # mhsize
    NB = 8                 # nb (number of position bins)
    cfg = {"nb": NB, "lratio": 1.0, "sratio": 1.0, "pratio": 1.0}

    key = jax.random.PRNGKey(0)
    kp, kt = jax.random.split(key)
    params = init_params(kp, vocab, D, H, NB)

    sent = jax.random.randint(kt, (B, S), 1, vocab, dtype=jnp.int32)
    mask = (jnp.ones((B, S), jnp.float32)
            .at[1, S - 3:].set(0.0)
            .at[7, S - 1:].set(0.0))

    # decoder targets are unused (decoders are external); placeholders
    tgt = jnp.zeros((B, S), jnp.int32)
    tgt_mask = jnp.ones((B, S), jnp.float32)
    tgt2 = jnp.zeros((B, S), jnp.int32)
    tgt_mask2 = jnp.ones((B, S), jnp.float32)

    doc_id = jnp.zeros((B,), jnp.int32)
    para_id = jnp.arange(B, dtype=jnp.float32) % 5.0
    pmask = jnp.ones((B, 5), jnp.float32)
    sent_id = jnp.arange(B, dtype=jnp.float32) % 10.0
    smask = jnp.ones((B, 10), jnp.float32)

    fwd = jax.jit(lambda p, *a: forward(p, cfg, *a))
    out = fwd(params, sent, mask, tgt, tgt_mask, tgt2, tgt_mask2,
              doc_id, para_id, pmask, sent_id, smask)
    out = jax.block_until_ready(out)
    loss, ll1, ll2, s_loss, p_loss = out
    assert jnp.isfinite(loss)
    assert jnp.isfinite(s_loss) and jnp.isfinite(p_loss)
    print("KERNEL_OK")
</pallas_src>

<mosaic_0001>
module attributes {stable_mosaic.version = 11 : i64} {
  func.func @fused_attn_mlp_ce_kernel(%arg0: i32, %arg1: memref<2x16x8x32xbf16, #tpu.memory_space<vmem>>, %arg2: memref<16x8x32xbf16, #tpu.memory_space<vmem>>, %arg3: memref<16x8xf32, #tpu.memory_space<vmem>>, %arg4: memref<2x16x1xi32, #tpu.memory_space<vmem>>, %arg5: memref<2x32x16xf32, #tpu.memory_space<vmem>>, %arg6: memref<2x1x16xf32, #tpu.memory_space<vmem>>, %arg7: memref<2x16x8xf32, #tpu.memory_space<vmem>>, %arg8: memref<2x1x8xf32, #tpu.memory_space<vmem>>, %arg9: memref<2x16xf32, #tpu.memory_space<vmem>>) attributes {dimension_semantics = [#tpu.dimension_semantics<parallel>], iteration_bounds = array<i64: 1>, scalar_prefetch = 0 : i64, scratch_operands = 0 : i64, tpu.core_type = #tpu.core_type<tc>, window_params = [{transform_indices = @transform_0, window_bounds = array<i64: 2, 16, 8, 32>}, {transform_indices = @transform_1, window_bounds = array<i64: 16, 8, 32>}, {transform_indices = @transform_2, window_bounds = array<i64: 16, 8>}, {transform_indices = @transform_3, window_bounds = array<i64: 2, 16, 1>}, {pipeline_mode = #tpu.pipeline_mode<synchronous>, transform_indices = @transform_4, window_bounds = array<i64: 2, 32, 16>}, {pipeline_mode = #tpu.pipeline_mode<synchronous>, transform_indices = @transform_5, window_bounds = array<i64: 2, 1, 16>}, {pipeline_mode = #tpu.pipeline_mode<synchronous>, transform_indices = @transform_6, window_bounds = array<i64: 2, 16, 8>}, {pipeline_mode = #tpu.pipeline_mode<synchronous>, transform_indices = @transform_7, window_bounds = array<i64: 2, 1, 8>}, {transform_indices = @transform_8, window_bounds = array<i64: 2, 16>}]} {
    %c0 = arith.constant 0 : index
    %c0_0 = arith.constant 0 : index
    %c0_1 = arith.constant 0 : index
    %0 = vector.load %arg2[%c0, %c0_0, %c0_1] : memref<16x8x32xbf16, #tpu.memory_space<vmem>>, vector<16x8x32xbf16>
    %1 = arith.extf %0 : vector<16x8x32xbf16> to vector<16x8x32xf32>
    %c0_2 = arith.constant 0 : index
    %c0_3 = arith.constant 0 : index
    %2 = vector.load %arg3[%c0_2, %c0_3] : memref<16x8xf32, #tpu.memory_space<vmem>>, vector<16x8xf32>
    %c0_4 = arith.constant 0 : index
    %c0_5 = arith.constant 0 : index
    %c0_6 = arith.constant 0 : index
    %c0_7 = arith.constant 0 : index
    %3 = vector.load %arg1[%c0_4, %c0_5, %c0_6, %c0_7] : memref<2x16x8x32xbf16, #tpu.memory_space<vmem>>, vector<1x16x8x32xbf16>
    %4 = vector.shape_cast %3 : vector<1x16x8x32xbf16> to vector<16x8x32xbf16>
    %5 = arith.extf %4 : vector<16x8x32xbf16> to vector<16x8x32xf32>
    %6 = arith.mulf %5, %1 : vector<16x8x32xf32>
    %cst = arith.constant dense<0.000000e+00> : vector<16x8xf32>
    %7 = vector.multi_reduction <add>, %6, %cst [2] : vector<16x8x32xf32> to vector<16x8xf32>
    %cst_8 = arith.constant 5.000000e-01 : f32
    %8 = vector.broadcast %cst_8 : f32 to vector<16x8xf32>
    %9 = arith.cmpf ogt, %2, %8 : vector<16x8xf32>
    %cst_9 = arith.constant -1.000000e+30 : f32
    %10 = vector.broadcast %cst_9 : f32 to vector<16x8xf32>
    %11 = arith.select %9, %7, %10 : vector<16x8xi1>, vector<16x8xf32>
    %cst_10 = arith.constant dense<0xFF800000> : vector<16xf32>
    %12 = vector.multi_reduction <maximumf>, %11, %cst_10 [1] : vector<16x8xf32> to vector<16xf32>
    %13 = vector.shape_cast %12 : vector<16xf32> to vector<16x1xf32>
    %14 = vector.broadcast %13 : vector<16x1xf32> to vector<16x8xf32>
    %15 = arith.subf %11, %14 : vector<16x8xf32>
    %16 = math.exp %15 : vector<16x8xf32>
    %cst_11 = arith.constant dense<0.000000e+00> : vector<16xf32>
    %17 = vector.multi_reduction <add>, %16, %cst_11 [1] : vector<16x8xf32> to vector<16xf32>
    %18 = vector.shape_cast %17 : vector<16xf32> to vector<16x1xf32>
    %19 = tpu.reciprocal %18 {approx = true} : vector<16x1xf32> -> vector<16x1xf32>
    %20 = vector.broadcast %19 : vector<16x1xf32> to vector<16x8xf32>
    %21 = arith.mulf %16, %20 : vector<16x8xf32>
    %22 = vector.shape_cast %21 : vector<16x8xf32> to vector<16x8x1xf32>
    %23 = vector.broadcast %22 : vector<16x8x1xf32> to vector<16x8x32xf32>
    %24 = arith.mulf %1, %23 : vector<16x8x32xf32>
    %cst_12 = arith.constant dense<0.000000e+00> : vector<16x32xf32>
    %25 = vector.multi_reduction <add>, %24, %cst_12 [1] : vector<16x8x32xf32> to vector<16x32xf32>
    %c0_13 = arith.constant 0 : index
    %c0_14 = arith.constant 0 : index
    %c0_15 = arith.constant 0 : index
    %26 = vector.load %arg5[%c0_13, %c0_14, %c0_15] : memref<2x32x16xf32, #tpu.memory_space<vmem>>, vector<1x32x16xf32>
    %27 = vector.shape_cast %26 : vector<1x32x16xf32> to vector<32x16xf32>
    %c0_16 = arith.constant 0 : index
    %c0_17 = arith.constant 0 : index
    %c0_18 = arith.constant 0 : index
    %28 = vector.load %arg6[%c0_16, %c0_17, %c0_18] : memref<2x1x16xf32, #tpu.memory_space<vmem>>, vector<1x1x16xf32>
    %29 = vector.shape_cast %28 : vector<1x1x16xf32> to vector<1x16xf32>
    %c0_19 = arith.constant 0 : index
    %c0_20 = arith.constant 0 : index
    %c0_21 = arith.constant 0 : index
    %30 = vector.load %arg7[%c0_19, %c0_20, %c0_21] : memref<2x16x8xf32, #tpu.memory_space<vmem>>, vector<1x16x8xf32>
    %31 = vector.shape_cast %30 : vector<1x16x8xf32> to vector<16x8xf32>
    %c0_22 = arith.constant 0 : index
    %c0_23 = arith.constant 0 : index
    %c0_24 = arith.constant 0 : index
    %32 = vector.load %arg8[%c0_22, %c0_23, %c0_24] : memref<2x1x8xf32, #tpu.memory_space<vmem>>, vector<1x1x8xf32>
    %33 = vector.shape_cast %32 : vector<1x1x8xf32> to vector<1x8xf32>
    %cst_25 = arith.constant dense<0.000000e+00> : vector<16x16xf32>
    %34 = tpu.matmul %25, %27, %cst_25 {dimension_numbers = #tpu.dot_dimension_numbers<[1], [0], [0], [1], [0, 0, 1, 1], [], []>} : vector<16x32xf32>, vector<32x16xf32>, vector<16x16xf32> -> vector<16x16xf32>
    %35 = vector.broadcast %29 : vector<1x16xf32> to vector<16x16xf32>
    %36 = arith.addf %34, %35 : vector<16x16xf32>
    %cst_26 = arith.constant 0.000000e+00 : f32
    %37 = vector.broadcast %cst_26 : f32 to vector<16x16xf32>
    %38 = arith.maximumf %36, %37 : vector<16x16xf32>
    %cst_27 = arith.constant dense<0.000000e+00> : vector<16x8xf32>
    %39 = tpu.matmul %38, %31, %cst_27 {dimension_numbers = #tpu.dot_dimension_numbers<[1], [0], [0], [1], [0, 0, 1, 1], [], []>} : vector<16x16xf32>, vector<16x8xf32>, vector<16x8xf32> -> vector<16x8xf32>
    %40 = vector.broadcast %33 : vector<1x8xf32> to vector<16x8xf32>
    %41 = arith.addf %39, %40 : vector<16x8xf32>
    %cst_28 = arith.constant dense<0xFF800000> : vector<16xf32>
    %42 = vector.multi_reduction <maximumf>, %41, %cst_28 [1] : vector<16x8xf32> to vector<16xf32>
    %43 = vector.shape_cast %42 : vector<16xf32> to vector<16x1xf32>
    %44 = vector.broadcast %43 : vector<16x1xf32> to vector<16x8xf32>
    %45 = arith.subf %41, %44 : vector<16x8xf32>
    %46 = math.exp %45 : vector<16x8xf32>
    %cst_29 = arith.constant dense<0.000000e+00> : vector<16xf32>
    %47 = vector.multi_reduction <add>, %46, %cst_29 [1] : vector<16x8xf32> to vector<16xf32>
    %48 = vector.shape_cast %47 : vector<16xf32> to vector<16x1xf32>
    %49 = math.log %48 : vector<16x1xf32>
    %50 = arith.addf %49, %43 : vector<16x1xf32>
    %51 = vector.broadcast %50 : vector<16x1xf32> to vector<16x8xf32>
    %52 = arith.subf %41, %51 : vector<16x8xf32>
    %c0_30 = arith.constant 0 : index
    %c0_31 = arith.constant 0 : index
    %c0_32 = arith.constant 0 : index
    %53 = vector.load %arg4[%c0_30, %c0_31, %c0_32] : memref<2x16x1xi32, #tpu.memory_space<vmem>>, vector<1x16x1xi32>
    %54 = vector.shape_cast %53 : vector<1x16x1xi32> to vector<16x1xi32>
    %55 = tpu.iota {dimensions = array<i32: 1>} : vector<16x8xi32>
    %56 = vector.broadcast %54 : vector<16x1xi32> to vector<16x8xi32>
    %57 = arith.cmpi eq, %55, %56 : vector<16x8xi32>
    %58 = arith.extui %57 : vector<16x8xi1> to vector<16x8xi32>
    %59 = arith.sitofp %58 : vector<16x8xi32> to vector<16x8xf32>
    %60 = arith.mulf %59, %52 : vector<16x8xf32>
    %cst_33 = arith.constant dense<0.000000e+00> : vector<16xf32>
    %61 = vector.multi_reduction <add>, %60, %cst_33 [1] : vector<16x8xf32> to vector<16xf32>
    %62 = vector.shape_cast %61 : vector<16xf32> to vector<16x1xf32>
    %cst_34 = arith.constant 0.000000e+00 : f32
    %63 = vector.broadcast %cst_34 : f32 to vector<16x1xf32>
    %64 = arith.subf %63, %62 : vector<16x1xf32>
    %65 = tpu.transpose %64, [1, 0] : vector<16x1xf32> -> vector<1x16xf32>
    %c1 = arith.constant 1 : index
    %c0_35 = arith.constant 0 : index
    %c0_36 = arith.constant 0 : index
    %c0_37 = arith.constant 0 : index
    %66 = vector.load %arg1[%c1, %c0_35, %c0_36, %c0_37] : memref<2x16x8x32xbf16, #tpu.memory_space<vmem>>, vector<1x16x8x32xbf16>
    %67 = vector.shape_cast %66 : vector<1x16x8x32xbf16> to vector<16x8x32xbf16>
    %68 = arith.extf %67 : vector<16x8x32xbf16> to vector<16x8x32xf32>
    %69 = arith.mulf %68, %1 : vector<16x8x32xf32>
    %cst_38 = arith.constant dense<0.000000e+00> : vector<16x8xf32>
    %70 = vector.multi_reduction <add>, %69, %cst_38 [2] : vector<16x8x32xf32> to vector<16x8xf32>
    %cst_39 = arith.constant 5.000000e-01 : f32
    %71 = vector.broadcast %cst_39 : f32 to vector<16x8xf32>
    %72 = arith.cmpf ogt, %2, %71 : vector<16x8xf32>
    %cst_40 = arith.constant -1.000000e+30 : f32
    %73 = vector.broadcast %cst_40 : f32 to vector<16x8xf32>
    %74 = arith.select %72, %70, %73 : vector<16x8xi1>, vector<16x8xf32>
    %cst_41 = arith.constant dense<0xFF800000> : vector<16xf32>
    %75 = vector.multi_reduction <maximumf>, %74, %cst_41 [1] : vector<16x8xf32> to vector<16xf32>
    %76 = vector.shape_cast %75 : vector<16xf32> to vector<16x1xf32>
    %77 = vector.broadcast %76 : vector<16x1xf32> to vector<16x8xf32>
    %78 = arith.subf %74, %77 : vector<16x8xf32>
    %79 = math.exp %78 : vector<16x8xf32>
    %cst_42 = arith.constant dense<0.000000e+00> : vector<16xf32>
    %80 = vector.multi_reduction <add>, %79, %cst_42 [1] : vector<16x8xf32> to vector<16xf32>
    %81 = vector.shape_cast %80 : vector<16xf32> to vector<16x1xf32>
    %82 = tpu.reciprocal %81 {approx = true} : vector<16x1xf32> -> vector<16x1xf32>
    %83 = vector.broadcast %82 : vector<16x1xf32> to vector<16x8xf32>
    %84 = arith.mulf %79, %83 : vector<16x8xf32>
    %85 = vector.shape_cast %84 : vector<16x8xf32> to vector<16x8x1xf32>
    %86 = vector.broadcast %85 : vector<16x8x1xf32> to vector<16x8x32xf32>
    %87 = arith.mulf %1, %86 : vector<16x8x32xf32>
    %cst_43 = arith.constant dense<0.000000e+00> : vector<16x32xf32>
    %88 = vector.multi_reduction <add>, %87, %cst_43 [1] : vector<16x8x32xf32> to vector<16x32xf32>
    %c1_44 = arith.constant 1 : index
    %c0_45 = arith.constant 0 : index
    %c0_46 = arith.constant 0 : index
    %89 = vector.load %arg5[%c1_44, %c0_45, %c0_46] : memref<2x32x16xf32, #tpu.memory_space<vmem>>, vector<1x32x16xf32>
    %90 = vector.shape_cast %89 : vector<1x32x16xf32> to vector<32x16xf32>
    %c1_47 = arith.constant 1 : index
    %c0_48 = arith.constant 0 : index
    %c0_49 = arith.constant 0 : index
    %91 = vector.load %arg6[%c1_47, %c0_48, %c0_49] : memref<2x1x16xf32, #tpu.memory_space<vmem>>, vector<1x1x16xf32>
    %92 = vector.shape_cast %91 : vector<1x1x16xf32> to vector<1x16xf32>
    %c1_50 = arith.constant 1 : index
    %c0_51 = arith.constant 0 : index
    %c0_52 = arith.constant 0 : index
    %93 = vector.load %arg7[%c1_50, %c0_51, %c0_52] : memref<2x16x8xf32, #tpu.memory_space<vmem>>, vector<1x16x8xf32>
    %94 = vector.shape_cast %93 : vector<1x16x8xf32> to vector<16x8xf32>
    %c1_53 = arith.constant 1 : index
    %c0_54 = arith.constant 0 : index
    %c0_55 = arith.constant 0 : index
    %95 = vector.load %arg8[%c1_53, %c0_54, %c0_55] : memref<2x1x8xf32, #tpu.memory_space<vmem>>, vector<1x1x8xf32>
    %96 = vector.shape_cast %95 : vector<1x1x8xf32> to vector<1x8xf32>
    %cst_56 = arith.constant dense<0.000000e+00> : vector<16x16xf32>
    %97 = tpu.matmul %88, %90, %cst_56 {dimension_numbers = #tpu.dot_dimension_numbers<[1], [0], [0], [1], [0, 0, 1, 1], [], []>} : vector<16x32xf32>, vector<32x16xf32>, vector<16x16xf32> -> vector<16x16xf32>
    %98 = vector.broadcast %92 : vector<1x16xf32> to vector<16x16xf32>
    %99 = arith.addf %97, %98 : vector<16x16xf32>
    %cst_57 = arith.constant 0.000000e+00 : f32
    %100 = vector.broadcast %cst_57 : f32 to vector<16x16xf32>
    %101 = arith.maximumf %99, %100 : vector<16x16xf32>
    %cst_58 = arith.constant dense<0.000000e+00> : vector<16x8xf32>
    %102 = tpu.matmul %101, %94, %cst_58 {dimension_numbers = #tpu.dot_dimension_numbers<[1], [0], [0], [1], [0, 0, 1, 1], [], []>} : vector<16x16xf32>, vector<16x8xf32>, vector<16x8xf32> -> vector<16x8xf32>
    %103 = vector.broadcast %96 : vector<1x8xf32> to vector<16x8xf32>
    %104 = arith.addf %102, %103 : vector<16x8xf32>
    %cst_59 = arith.constant dense<0xFF800000> : vector<16xf32>
    %105 = vector.multi_reduction <maximumf>, %104, %cst_59 [1] : vector<16x8xf32> to vector<16xf32>
    %106 = vector.shape_cast %105 : vector<16xf32> to vector<16x1xf32>
    %107 = vector.broadcast %106 : vector<16x1xf32> to vector<16x8xf32>
    %108 = arith.subf %104, %107 : vector<16x8xf32>
    %109 = math.exp %108 : vector<16x8xf32>
    %cst_60 = arith.constant dense<0.000000e+00> : vector<16xf32>
    %110 = vector.multi_reduction <add>, %109, %cst_60 [1] : vector<16x8xf32> to vector<16xf32>
    %111 = vector.shape_cast %110 : vector<16xf32> to vector<16x1xf32>
    %112 = math.log %111 : vector<16x1xf32>
    %113 = arith.addf %112, %106 : vector<16x1xf32>
    %114 = vector.broadcast %113 : vector<16x1xf32> to vector<16x8xf32>
    %115 = arith.subf %104, %114 : vector<16x8xf32>
    %c1_61 = arith.constant 1 : index
    %c0_62 = arith.constant 0 : index
    %c0_63 = arith.constant 0 : index
    %116 = vector.load %arg4[%c1_61, %c0_62, %c0_63] : memref<2x16x1xi32, #tpu.memory_space<vmem>>, vector<1x16x1xi32>
    %117 = vector.shape_cast %116 : vector<1x16x1xi32> to vector<16x1xi32>
    %118 = tpu.iota {dimensions = array<i32: 1>} : vector<16x8xi32>
    %119 = vector.broadcast %117 : vector<16x1xi32> to vector<16x8xi32>
    %120 = arith.cmpi eq, %118, %119 : vector<16x8xi32>
    %121 = arith.extui %120 : vector<16x8xi1> to vector<16x8xi32>
    %122 = arith.sitofp %121 : vector<16x8xi32> to vector<16x8xf32>
    %123 = arith.mulf %122, %115 : vector<16x8xf32>
    %cst_64 = arith.constant dense<0.000000e+00> : vector<16xf32>
    %124 = vector.multi_reduction <add>, %123, %cst_64 [1] : vector<16x8xf32> to vector<16xf32>
    %125 = vector.shape_cast %124 : vector<16xf32> to vector<16x1xf32>
    %cst_65 = arith.constant 0.000000e+00 : f32
    %126 = vector.broadcast %cst_65 : f32 to vector<16x1xf32>
    %127 = arith.subf %126, %125 : vector<16x1xf32>
    %128 = tpu.transpose %127, [1, 0] : vector<16x1xf32> -> vector<1x16xf32>
    %129 = tpu.concatenate %65, %128 in 0 : vector<1x16xf32>, vector<1x16xf32> -> vector<2x16xf32>
    %c0_66 = arith.constant 0 : index
    %c0_67 = arith.constant 0 : index
    %130 = vector.load %arg9[%c0_66, %c0_67] : memref<2x16xf32, #tpu.memory_space<vmem>>, vector<2x16xf32>
    tpu.vector_store %arg9[%c0_66, %c0_67], %129 {strides = array<i32>} : memref<2x16xf32, #tpu.memory_space<vmem>>, vector<2x16xf32>,
    return
  }
  func.func @transform_0(%arg0: i32) -> (i32, i32, i32, i32) {
    %c0_i32 = arith.constant 0 : i32
    %c0_i32_0 = arith.constant 0 : i32
    %c0_i32_1 = arith.constant 0 : i32
    %c0_i32_2 = arith.constant 0 : i32
    return %c0_i32, %arg0, %c0_i32_0, %c0_i32_1 : i32, i32, i32, i32
  }
  func.func @transform_1(%arg0: i32) -> (i32, i32, i32) {
    %c0_i32 = arith.constant 0 : i32
    %c0_i32_0 = arith.constant 0 : i32
    %c0_i32_1 = arith.constant 0 : i32
    return %arg0, %c0_i32, %c0_i32_0 : i32, i32, i32
  }
  func.func @transform_2(%arg0: i32) -> (i32, i32) {
    %c0_i32 = arith.constant 0 : i32
    %c0_i32_0 = arith.constant 0 : i32
    return %arg0, %c0_i32 : i32, i32
  }
  func.func @transform_3(%arg0: i32) -> (i32, i32, i32) {
    %c0_i32 = arith.constant 0 : i32
    %c0_i32_0 = arith.constant 0 : i32
    %c0_i32_1 = arith.constant 0 : i32
    return %c0_i32, %arg0, %c0_i32_0 : i32, i32, i32
  }
  func.func @transform_4(%arg0: i32) -> (i32, i32, i32) {
    %c0_i32 = arith.constant 0 : i32
    %c0_i32_0 = arith.constant 0 : i32
    %c0_i32_1 = arith.constant 0 : i32
    %c0_i32_2 = arith.constant 0 : i32
    return %c0_i32, %c0_i32_0, %c0_i32_1 : i32, i32, i32
  }
  func.func @transform_5(%arg0: i32) -> (i32, i32, i32) {
    %c0_i32 = arith.constant 0 : i32
    %c0_i32_0 = arith.constant 0 : i32
    %c0_i32_1 = arith.constant 0 : i32
    %c0_i32_2 = arith.constant 0 : i32
    return %c0_i32, %c0_i32_0, %c0_i32_1 : i32, i32, i32
  }
  func.func @transform_6(%arg0: i32) -> (i32, i32, i32) {
    %c0_i32 = arith.constant 0 : i32
    %c0_i32_0 = arith.constant 0 : i32
    %c0_i32_1 = arith.constant 0 : i32
    %c0_i32_2 = arith.constant 0 : i32
    return %c0_i32, %c0_i32_0, %c0_i32_1 : i32, i32, i32
  }
  func.func @transform_7(%arg0: i32) -> (i32, i32, i32) {
    %c0_i32 = arith.constant 0 : i32
    %c0_i32_0 = arith.constant 0 : i32
    %c0_i32_1 = arith.constant 0 : i32
    %c0_i32_2 = arith.constant 0 : i32
    return %c0_i32, %c0_i32_0, %c0_i32_1 : i32, i32, i32
  }
  func.func @transform_8(%arg0: i32) -> (i32, i32) {
    %c0_i32 = arith.constant 0 : i32
    %c0_i32_0 = arith.constant 0 : i32
    return %c0_i32, %arg0 : i32, i32
  }
}

</mosaic_0001>

<bundles_post_ra>
// kernel: custom-call.10
= control target key start
LH: loop header
LB: loop body
LE: loop exit
PB: predicated region body
PF: predicated region fallthrough
CT: control target
= control target key end

     0   :  { %s6_s0 = inlined_call_operand.vmem [shape: u32[16], index: 0, kind: output, shape index: {}]  }

// kernel: _lambda_.1
= control target key start
LH: loop header
LB: loop body
LE: loop exit
PB: predicated region body
PF: predicated region fallthrough
CT: control target
= control target key end

     0   :  { %vm111_vm0 = vcmask 261120   ;;  %vm244_vm1 = vcmask 1041409   ;;  %vm246_vm2 = vcmask 1042434   ;;  %vm248_vm3 = vcmask 1043459   ;;  %s2459_s0 = inlined_call_operand.vmem [shape: bf16[2,16,8,32], index: 0, kind: input, shape index: {}]   ;;  %s2460_s1 = inlined_call_operand.vmem [shape: bf16[16,8,32], index: 1, kind: input, shape index: {}]   ;;  %s2461_s2 = inlined_call_operand.vmem [shape: f32[16,8], index: 2, kind: input, shape index: {}]   ;;  %s2462_s4 = inlined_call_operand.vmem [shape: f32[2,32,16], index: 4, kind: input, shape index: {}]   ;;  %s2463_s6 = inlined_call_operand.vmem [shape: f32[2,16,8], index: 6, kind: input, shape index: {}]   ;;  %s2464_s5 = inlined_call_operand.vmem [shape: f32[2,1,16], index: 5, kind: input, shape index: {}]   ;;  %s2465_s7 = inlined_call_operand.vmem [shape: f32[2,1,8], index: 7, kind: input, shape index: {}]   ;;  %s2466_s3 = inlined_call_operand.vmem [shape: s32[2,16,1], index: 3, kind: input, shape index: {}]   ;;  %s2467_s8 = inlined_call_operand.vmem [shape: f32[2,16], index: 8, kind: output, shape index: {}]  }
   0x1   :  { %v1732_v0 = vld [vmem:[%s2460_s1 + $0x8] sm:$0xff]   ;;  %v1637_v2 = vld [vmem:[%s2460_s1] sm:$0xff]   ;;  %v1733_v22 = vld [vmem:[%s2460_s1 + $0x10] sm:$0xff]   ;;  %vm250_vm4 = vcmask 1044484   ;;  %vm252_vm5 = vcmask 1045509   ;;  %vm254_vm6 = vcmask 1046534  }
   0x2   :  { %v1739_v1 = vld [vmem:[%s2459_s0 + $0x8] sm:$0xff]   ;;  %v1926_v3 = vunpack.c.l.bf16 %v1732_v0  ;;  %v1928_v5 = vunpack.c.l.bf16 %v1637_v2  ;;  %v1669_v6 = vld [vmem:[%s2459_s0] sm:$0xff]   ;;  %v1939_v9 = vunpack.c.h.bf16 %v1637_v2  ;;  %v1944_v15 = vunpack.c.h.bf16 %v1732_v0  ;;  %v1740_v23 = vld [vmem:[%s2459_s0 + $0x10] sm:$0xff]  }
   0x3   :  { %v1674_v4 = vunpack.c.l.bf16 %v1739_v1  ;;  %v1735_v7 = vld [vmem:[%s2460_s1 + $0x20] sm:$0xff]   ;;  %v1670_v10 = vunpack.c.l.bf16 %v1669_v6  ;;  %v1671_v13 = vunpack.c.h.bf16 %v1669_v6  ;;  %v1675_v16 = vunpack.c.h.bf16 %v1739_v1  ;;  %v1736_v25 = vld [vmem:[%s2460_s1 + $0x28] sm:$0xff]   ;;  %v1734_v44 = vld [vmem:[%s2460_s1 + $0x18] sm:$0xff]  }
   0x4   :  { %v1742_v8 = vld [vmem:[%s2459_s0 + $0x20] sm:$0xff]   ;;  %v1941_v11 = vunpack.c.l.bf16 %v1735_v7  ;;  %v1946_v17 = vunpack.c.h.bf16 %v1735_v7  ;;  %v1743_v26 = vld [vmem:[%s2459_s0 + $0x28] sm:$0xff]   ;;  %v1967_v30 = vunpack.c.l.bf16 %v1733_v22  ;;  %v1678_v31 = vunpack.c.l.bf16 %v1740_v23  ;;  %v1741_v45 = vld [vmem:[%s2459_s0 + $0x18] sm:$0xff]  }
   0x5   :  { %v1686_v12 = vunpack.c.l.bf16 %v1742_v8  ;;  %v97_v14 = vmul.f32 %v1674_v4, %v1926_v3  ;;  %v95_v18 = vmul.f32 %v1670_v10, %v1928_v5  ;;  %v96_v20 = vmul.f32 %v1671_v13, %v1939_v9  ;;  %v1737_v46 = vld [vmem:[%s2460_s1 + $0x30] sm:$0xff]   ;;  %v1738_v0 = vld [vmem:[%s2460_s1 + $0x38] sm:$0xff]  }
   0x6   :  { %v1687_v21 = vunpack.c.h.bf16 %v1742_v8  ;;  %v98_v29 = vmul.f32 %v1675_v16, %v1944_v15  ;;  %v1971_v34 = vunpack.c.l.bf16 %v1736_v25  ;;  %v1690_v35 = vunpack.c.l.bf16 %v1743_v26  ;;  %v1744_v47 = vld [vmem:[%s2459_s0 + $0x30] sm:$0xff]   ;;  %v1745_v1 = vld [vmem:[%s2459_s0 + $0x38] sm:$0xff]  }
   0x7   :  { %v103_v19 = vmul.f32 %v1686_v12, %v1941_v11  ;;  %v118_v24 = vsel %vm111_vm0, %v97_v14, 0.0  ;;  %v112_v27 = vsel %vm111_vm0, %v95_v18, 0.0  ;;  %v115_v32 = vsel %vm111_vm0, %v96_v20, 0.0 }
   0x8   :  { %119 = vadd.xlane.f32.xlu1 %v118_v24  ;;  %113 = vadd.xlane.f32.xlu0 %v112_v27  ;;  %v104_v33 = vmul.f32 %v1687_v21, %v1946_v17  ;;  %v121_v36 = vsel %vm111_vm0, %v98_v29, 0.0  ;;  %v99_v37 = vmul.f32 %v1678_v31, %v1967_v30  ;;  %v1975_v38 = vunpack.c.h.bf16 %v1733_v22 }
   0x9   :  { %v136_v28 = vsel %vm111_vm0, %v103_v19, 0.0  ;;  %v1679_v39 = vunpack.c.h.bf16 %v1740_v23  ;;  %v105_v41 = vmul.f32 %v1690_v35, %v1971_v34  ;;  %v1979_v42 = vunpack.c.h.bf16 %v1736_v25 }
   0xa   :  { %v139_v40 = vsel %vm111_vm0, %v104_v33, 0.0  ;;  %v1691_v43 = vunpack.c.h.bf16 %v1743_v26  ;;  %v124_v48 = vsel %vm111_vm0, %v99_v37, 0.0  ;;  %v1995_v50 = vunpack.c.l.bf16 %v1734_v44 }
   0xb   :  { %v100_v49 = vmul.f32 %v1679_v39, %v1975_v38  ;;  %v1682_v51 = vunpack.c.l.bf16 %v1741_v45  ;;  %v142_v52 = vsel %vm111_vm0, %v105_v41, 0.0  ;;  %v1999_v54 = vunpack.c.l.bf16 %v1737_v46 }
   0xc   :  { %137 = vadd.xlane.f32.xlu1 %v136_v28  ;;  %116 = vadd.xlane.f32.xlu0 %v115_v32  ;;  %v106_v53 = vmul.f32 %v1691_v43, %v1979_v42  ;;  %v1694_v55 = vunpack.c.l.bf16 %v1744_v47  ;;  %v2003_v58 = vunpack.c.h.bf16 %v1734_v44  ;;  %v1683_v59 = vunpack.c.h.bf16 %v1741_v45 }
   0xd   :  { %v127_v56 = vsel %vm111_vm0, %v100_v49, 0.0  ;;  %v101_v57 = vmul.f32 %v1682_v51, %v1995_v50  ;;  %v2007_v62 = vunpack.c.h.bf16 %v1737_v46  ;;  %v1695_v63 = vunpack.c.h.bf16 %v1744_v47  ;;  %v2047_v49 = vld [vmem:[%s2461_s2] sm:$0xff] }
   0xe   :  { %v145_v60 = vsel %vm111_vm0, %v106_v53, 0.0  ;;  %v107_v61 = vmul.f32 %v1694_v55, %v1999_v54  ;;  %v102_v4 = vmul.f32 %v1683_v59, %v2003_v58  ;;  %v2017_v6 = vunpack.c.h.bf16 %v1738_v0 }
   0xf   :  { %v130_v2 = vsel %vm111_vm0, %v101_v57, 0.0  ;;  %v1699_v7 = vunpack.c.h.bf16 %v1745_v1  ;;  %v108_v10 = vmul.f32 %v1695_v63, %v2007_v62  ;;  %v2021_v12 = vunpack.c.l.bf16 %v1738_v0 }
  0x10   :  { %122 = vadd.xlane.f32.xlu1 %v121_v36  ;;  %140 = vadd.xlane.f32.xlu0 %v139_v40  ;;  %2472 = vst [vmem:[#allocation2_spill] sm:$0xff] %v2017_v6  ;;  %v148_v8 = vsel %vm111_vm0, %v107_v61, 0.0  ;;  %v1698_v13 = vunpack.c.l.bf16 %v1745_v1  ;;  %v133_v14 = vsel %vm111_vm0, %v102_v4, 0.0  ;;  %v178_v25 = vlaneseq }
  0x11   :  { %2473 = vst [vmem:[#allocation3_spill] sm:$0xff] %v2021_v12  ;;  %v110_v16 = vmul.f32 %v1699_v7, %v2017_v6  ;;  %v151_v18 = vsel %vm111_vm0, %v108_v10, 0.0  ;;  %vm160_vm7 = vcmp.gt.f32.partialorder %v2047_v49, 0.5  ;;  %vm256_vm8 = vcmask 1047559  }
  0x12   :  { %v109_v19 = vmul.f32 %v1698_v13, %v2021_v12  ;;  %v2029_v28 = vand.u32 127, %v178_v25  ;;  %v2031_v29 = vshrl.u32 %v178_v25, 7  ;;  %vm269_vm9 = vcmask 64512  }
  0x13   :  { %v157_v20 = vsel %vm111_vm0, %v110_v16, 0.0  ;;  %vm663_vm11 = vcmask 130048  }
  0x14   :  { %125 = vadd.xlane.f32.xlu1 %v124_v48  ;;  %143 = vadd.xlane.f32.xlu0 %v142_v52  ;;  %v154_v21 = vsel %vm111_vm0, %v109_v19, 0.0  ;;  %2474 = vst [vmem:[#allocation4_spill] sm:$0xff] %v2029_v28  ;;  %v2035_v33 = vsub.s32 %v2029_v28, %v2031_v29 }
  0x18   :  { %128 = vadd.xlane.f32.xlu1 %v127_v56  ;;  %146 = vadd.xlane.f32.xlu0 %v145_v60 }
  0x1c   :  { %131 = vadd.xlane.f32.xlu1 %v130_v2  ;;  %149 = vadd.xlane.f32.xlu0 %v148_v8 }
  0x20   :  { %134 = vadd.xlane.f32.xlu1 %v133_v14  ;;  %152 = vadd.xlane.f32.xlu0 %v151_v18  ;;  %v2071_v18 = vld [vmem:[%s2461_s2 + $0x8] sm:$0xff] }
  0x21   :  { %vm161_vm10 = vcmp.gt.f32.partialorder %v2071_v18, 0.5 }
  0x24   :  { %158 = vadd.xlane.f32.xlu1 %v157_v20  ;;  %155 = vadd.xlane.f32.xlu0 %v154_v21 }
  0x95   :  { %v120_v22 = vpop.xlane.xlu1 %119  ;;  %v114_v23 = vpop.xlane.xlu0 %113 }
  0x96   :  { %v183_v36 = vrot.slane %v114_v23, %v2035_v33  ;;  %v191_v44 = vrot.slane %v120_v22, %v2035_v33 }
  0x99   :  { %v138_v24 = vpop.xlane.xlu1 %137  ;;  %v117_v26 = vpop.xlane.xlu0 %116 }
  0x9a   :  { %v187_v37 = vrot.slane %v117_v26, %v2035_v33  ;;  %v215_v60 = vrot.slane %v138_v24, %v2035_v33 }
  0x9c   :  { %v245_v41 = vsel %vm244_vm1, %v187_v37, %v183_v36 }
  0x9d   :  { %v123_v27 = vpop.xlane.xlu1 %122  ;;  %v141_v31 = vpop.xlane.xlu0 %140  ;;  %v247_v51 = vsel %vm246_vm2, %v191_v44, %v245_v41 }
  0x9e   :  { %v195_v43 = vrot.slane %v123_v27, %v2035_v33  ;;  %v219_v55 = vrot.slane %v141_v31, %v2035_v33 }
  0xa0   :  { %v249_v53 = vsel %vm248_vm3, %v195_v43, %v247_v51  ;;  %v258_v7 = vsel %vm244_vm1, %v219_v55, %v215_v60  ;;  %v1750_v51 = vld [vmem:[%s2459_s0 + $0x60] sm:$0xff]  }
  0xa1   :  { %v126_v32 = vpop.xlane.xlu1 %125  ;;  %v144_v35 = vpop.xlane.xlu0 %143 }
  0xa2   :  { %v199_v45 = vrot.slane %v126_v32, %v2035_v33  ;;  %v223_v57 = vrot.slane %v144_v35, %v2035_v33  ;;  %v1746_v35 = vld [vmem:[%s2459_s0 + $0x40] sm:$0xff]  }
  0xa3   :  { %v1703_v36 = vunpack.c.h.bf16 %v1746_v35 }
  0xa4   :  { %v251_v56 = vsel %vm250_vm4, %v199_v45, %v249_v53  ;;  %v259_v13 = vsel %vm246_vm2, %v223_v57, %v258_v7  ;;  %v1718_v57 = vunpack.c.l.bf16 %v1750_v51 }
  0xa5   :  { %v129_v39 = vpop.xlane.xlu1 %128  ;;  %v147_v40 = vpop.xlane.xlu0 %146  ;;  %v861_v37 = vmul.f32 %v1703_v36, %v1939_v9 }
  0xa6   :  { %v203_v47 = vrot.slane %v129_v39, %v2035_v33  ;;  %v227_v63 = vrot.slane %v147_v40, %v2035_v33 }
  0xa7   :  { %v879_v39 = vsel %vm111_vm0, %v861_v37, 0.0 }
  0xa8   :  { %v253_v61 = vsel %vm252_vm5, %v203_v47, %v251_v56  ;;  %v260_v19 = vsel %vm248_vm3, %v227_v63, %v259_v13  ;;  %v1702_v47 = vunpack.c.l.bf16 %v1746_v35  ;;  %v1751_v63 = vld [vmem:[%s2459_s0 + $0x68] sm:$0xff]  }
  0xa9   :  { %v132_v46 = vpop.xlane.xlu1 %131  ;;  %v150_v48 = vpop.xlane.xlu0 %149  ;;  %v1722_v13 = vunpack.c.l.bf16 %v1751_v63 }
  0xaa   :  { %v207_v52 = vrot.slane %v132_v46, %v2035_v33  ;;  %v231_v2 = vrot.slane %v150_v48, %v2035_v33  ;;  %v1747_v48 = vld [vmem:[%s2459_s0 + $0x48] sm:$0xff]  }
  0xab   :  { %v1706_v53 = vunpack.c.l.bf16 %v1747_v48 }
  0xac   :  { %v255_v4 = vsel %vm254_vm6, %v207_v52, %v253_v61  ;;  %v261_v23 = vsel %vm250_vm4, %v231_v2, %v260_v19  ;;  %v860_v52 = vmul.f32 %v1702_v47, %v1928_v5  ;;  %v1719_v61 = vunpack.c.h.bf16 %v1750_v51 }
  0xad   :  { %v135_v59 = vpop.xlane.xlu1 %134  ;;  %v153_v1 = vpop.xlane.xlu0 %152  ;;  %v862_v60 = vmul.f32 %v1706_v53, %v1926_v3 }
  0xae   :  { %v211_v0 = vrot.slane %v135_v59, %v2035_v33  ;;  %v235_v8 = vrot.slane %v153_v1, %v2035_v33  ;;  %v876_v59 = vsel %vm111_vm0, %v860_v52, 0.0  ;;  %v1707_v1 = vunpack.c.h.bf16 %v1747_v48 }
  0xb0   :  { %v257_v10 = vsel %vm256_vm8, %v211_v0, %v255_v4  ;;  %v262_v25 = vsel %vm252_vm5, %v235_v8, %v261_v23  ;;  %v868_v0 = vmul.f32 %v1718_v57, %v1941_v11  ;;  %v1748_v4 = vld [vmem:[%s2459_s0 + $0x50] sm:$0xff]   ;;  %v882_v8 = vsel %vm111_vm0, %v862_v60, 0.0 }
  0xb1   :  { %v159_v14 = vpop.xlane.xlu1 %158  ;;  %v267_v16 = vsel %vm160_vm7, %v257_v10, -1e+30  ;;  %v156_v20 = vpop.xlane.xlu0 %155  ;;  %v869_v10 = vmul.f32 %v1719_v61, %v1946_v17  ;;  %v1710_v19 = vunpack.c.l.bf16 %v1748_v4  ;;  %v1752_v23 = vld [vmem:[%s2459_s0 + $0x70] sm:$0xff]  }
  0xb2   :  { %v243_v21 = vrot.slane %v159_v14, %v2035_v33  ;;  %v270_v22 = vsel %vm269_vm9, %v267_v16, -inf  ;;  %v239_v24 = vrot.slane %v156_v20, %v2035_v33  ;;  %v900_v14 = vsel %vm111_vm0, %v868_v0, 0.0 }
  0xb3   :  { %271 = vmax.xlane.f32.xlu0 %v270_v22  ;;  %v903_v20 = vsel %vm111_vm0, %v869_v10, 0.0  ;;  %v1723_v22 = vunpack.c.h.bf16 %v1751_v63  ;;  %v1726_v35 = vunpack.c.l.bf16 %v1752_v23  ;;  %v2152_v10 = vsub.s32 1, %v2031_v29 }
  0xb4   :  { %v263_v26 = vsel %vm254_vm6, %v239_v24, %v262_v25  ;;  %v864_v25 = vmul.f32 %v1710_v19, %v1967_v30 }
  0xb5   :  { %v264_v27 = vsel %vm256_vm8, %v243_v21, %v263_v26  ;;  %v870_v21 = vmul.f32 %v1722_v13, %v1971_v34  ;;  %v1711_v26 = vunpack.c.h.bf16 %v1748_v4  ;;  %v2155_v13 = vsub.s32 0, %v2031_v29 }
  0xb6   :  { %v268_v31 = vsel %vm161_vm10, %v264_v27, -1e+30  ;;  %v1749_v27 = vld [vmem:[%s2459_s0 + $0x58] sm:$0xff]   ;;  %v888_v36 = vsel %vm111_vm0, %v864_v25, 0.0 }
  0xb7   :  { %v273_v32 = vsel %vm269_vm9, %v268_v31, -inf  ;;  %v865_v37 = vmul.f32 %v1711_v26, %v1975_v38  ;;  %v1715_v47 = vunpack.c.h.bf16 %v1749_v27  ;;  %v2168_v26 = vsub.s32 3, %v2031_v29 }
  0xb8   :  { %274 = vmax.xlane.f32.xlu1 %v273_v32  ;;  %v871_v32 = vmul.f32 %v1723_v22, %v1979_v42 }
  0xbc   :  { %880 = vadd.xlane.f32.xlu1 %v879_v39  ;;  %v1714_v39 = vunpack.c.l.bf16 %v1749_v27 }
 0x140   :  { %v272_v40 = vpop.xlane.xlu0 %271 }
 0x141   :  { %v276_v41 = vsub.f32 %v267_v16, %v272_v40  ;;  %v863_v16 = vmul.f32 %v1707_v1, %v1944_v15  ;;  %v909_v40 = vsel %vm111_vm0, %v871_v32, 0.0  ;;  %v2173_v32 = vsub.s32 4, %v2031_v29 }
 0x143   :  { %v278_v43 = vmul.f32 1.442695, %v276_v41  ;;  %v885_v24 = vsel %vm111_vm0, %v863_v16, 0.0  ;;  %v872_v41 = vmul.f32 %v1726_v35, %v1999_v54 }
 0x145   :  { %1838 = vpow2.f32 %v278_v43  ;;  %v275_v44 = vpop.xlane.xlu1 %274  ;;  %v1727_v43 = vunpack.c.h.bf16 %v1752_v23  ;;  %v912_v48 = vsel %vm111_vm0, %v872_v41, 0.0 }
 0x146   :  { %v277_v45 = vsub.f32 %v268_v31, %v275_v44  ;;  %v906_v31 = vsel %vm111_vm0, %v870_v21, 0.0  ;;  %v1753_v44 = vld [vmem:[%s2459_s0 + $0x78] sm:$0xff]   ;;  %v2161_v21 = vsub.s32 2, %v2031_v29 }
 0x147   :  { %v873_v51 = vmul.f32 %v1727_v43, %v2007_v62  ;;  %v1730_v52 = vunpack.c.l.bf16 %v1753_v44  ;;  %v1731_v57 = vunpack.c.h.bf16 %v1753_v44  ;;  %v2183_v44 = vsub.s32 6, %v2031_v29 }
 0x148   :  { %v280_v46 = vmul.f32 1.442695, %v277_v45  ;;  %v891_v45 = vsel %vm111_vm0, %v865_v37, 0.0 }
 0x149   :  { %v874_v60 = vmul.f32 %v1730_v52, %v2021_v12  ;;  %v875_v63 = vmul.f32 %v1731_v57, %v2017_v6 }
 0x14a   :  { %1840 = vpow2.f32 %v280_v46  ;;  %v866_v46 = vmul.f32 %v1714_v39, %v1995_v50  ;;  %v2178_v39 = vsub.s32 5, %v2031_v29 }
 0x14b   :  { %v918_v0 = vsel %vm111_vm0, %v874_v60, 0.0  ;;  %v921_v1 = vsel %vm111_vm0, %v875_v63, 0.0  ;;  %v533_v60 = vld [vmem:[%s2462_s4 + $0x8] sm:$0xff] }
 0x14c   :  { %v894_v53 = vsel %vm111_vm0, %v866_v46, 0.0 }
 0x14f   :  { %v2097_v55 = vpop.eup %1838 }
 0x150   :  { %v282_v56 = vsel %vm269_vm9, %v2097_v55, 0.0 }
 0x151   :  { %283 = vadd.xlane.f32.xlu0 %v282_v56  ;;  %v867_v56 = vmul.f32 %v1715_v47, %v2003_v58 }
 0x153   :  { %v897_v61 = vsel %vm111_vm0, %v867_v56, 0.0 }
 0x154   :  { %v2107_v2 = vpop.eup %1840 }
 0x155   :  { %877 = vadd.xlane.f32.xlu0 %v876_v59  ;;  %v285_v7 = vsel %vm269_vm9, %v2107_v2, 0.0  ;;  %v915_v59 = vsel %vm111_vm0, %v873_v51, 0.0  ;;  %v2188_v51 = vsub.s32 7, %v2031_v29 }
 0x156   :  { %286 = vadd.xlane.f32.xlu1 %v285_v7  ;;  %v2149_v7 = vpop.xlane.xlu1 %880 }
 0x159   :  { %883 = vadd.xlane.f32.xlu0 %v882_v8 }
 0x15a   :  { %901 = vadd.xlane.f32.xlu1 %v900_v14 }
 0x15d   :  { %904 = vadd.xlane.f32.xlu0 %v903_v20 }
 0x15e   :  { %886 = vadd.xlane.f32.xlu1 %v885_v24 }
 0x161   :  { %907 = vadd.xlane.f32.xlu0 %v906_v31 }
 0x162   :  { %889 = vadd.xlane.f32.xlu1 %v888_v36 }
 0x165   :  { %910 = vadd.xlane.f32.xlu0 %v909_v40 }
 0x166   :  { %892 = vadd.xlane.f32.xlu1 %v891_v45 }
 0x169   :  { %913 = vadd.xlane.f32.xlu0 %v912_v48 }
 0x16a   :  { %895 = vadd.xlane.f32.xlu1 %v894_v53 }
 0x16d   :  { %916 = vadd.xlane.f32.xlu0 %v915_v59  ;;  %v532_v59 = vld [vmem:[%s2462_s4] sm:$0xff] }
 0x16e   :  { %898 = vadd.xlane.f32.xlu1 %v897_v61  ;;  %v1810_v61 = vpack.c.bf16 %v533_v60, %v532_v59 }
 0x170   :  { %1811 = vmatprep.subr.bf16.mxu0 %v1810_v61 }
 0x171   :  { %919 = vadd.xlane.f32.xlu0 %v918_v0  ;;  %1813 = vmatpush3.bf16.msra.mxu0 %v1810_v61  ;;  %v534_v0 = vld [vmem:[%s2462_s4 + $0x10] sm:$0xff] }
 0x172   :  { %922 = vadd.xlane.f32.xlu1 %v921_v1  ;;  %v535_v1 = vld [vmem:[%s2462_s4 + $0x18] sm:$0xff] }
 0x1de   :  { %v284_v4 = vpop.xlane.xlu0 %283 }
 0x1df   :  { %1842 = vrcp.f32 %v284_v4  ;;  %v1814_v4 = vpack.c.bf16 %v535_v1, %v534_v0 }
 0x1e1   :  { %1815 = vmatprep.subr.bf16.mxu0 %v1814_v4 }
 0x1e2   :  { %1817 = vmatpush3.bf16.msra.mxu0 %v1814_v4 }
 0x1e3   :  { %v287_v8 = vpop.xlane.xlu1 %286 }
 0x1e4   :  { %1844 = vrcp.f32 %v287_v8 }
 0x1e7   :  { %v902_v36 = vpop.xlane.xlu1 %901 }
 0x1e9   :  { %v1843_v14 = vpop.eup %1842 }
 0x1ea   :  { %v290_v16 = vmul.f32 %v1843_v14, %v2097_v55 }
 0x1eb   :  { %v887_v45 = vpop.xlane.xlu1 %886 }
 0x1ec   :  { %v302_v19 = vrot.slane %v290_v16, %v2152_v10  ;;  %v295_v20 = vrot.slane %v290_v16, %v2155_v13  ;;  %v309_v24 = vrot.slane %v290_v16, %v2161_v21  ;;  %v316_v31 = vrot.slane %v290_v16, %v2168_v26 }
 0x1ed   :  { %v323_v37 = vrot.slane %v290_v16, %v2173_v32  ;;  %v330_v43 = vrot.slane %v290_v16, %v2178_v39  ;;  %v337_v48 = vrot.slane %v290_v16, %v2183_v44  ;;  %v344_v56 = vrot.slane %v290_v16, %v2188_v51 }
 0x1ee   :  { %304 = vbcast.lane.b32.xlu1 %v302_v19, 256  ;;  %297 = vbcast.lane.b32.xlu0 %v295_v20, 256  ;;  %v1845_v22 = vpop.eup %1844  ;;  %v975_v16 = vrot.slane %v902_v36, %v2035_v33 }
 0x1ef   :  { %v291_v23 = vmul.f32 %v1845_v22, %v2107_v2  ;;  %v878_v2 = vpop.xlane.xlu0 %877  ;;  %v890_v53 = vpop.xlane.xlu1 %889  ;;  %v947_v22 = vrot.slane %v2149_v7, %v2035_v33 }
 0x1f1   :  { %v358_v25 = vrot.slane %v291_v23, %v2152_v10  ;;  %v351_v55 = vrot.slane %v291_v23, %v2155_v13  ;;  %v365_v27 = vrot.slane %v291_v23, %v2161_v21  ;;  %v372_v35 = vrot.slane %v291_v23, %v2168_v26 }
 0x1f2   :  { %311 = vbcast.lane.b32.xlu1 %v309_v24, 256  ;;  %v379_v40 = vrot.slane %v291_v23, %v2173_v32  ;;  %v386_v46 = vrot.slane %v291_v23, %v2178_v39  ;;  %v393_v52 = vrot.slane %v291_v23, %v2183_v44  ;;  %v400_v29 = vrot.slane %v291_v23, %v2188_v51 }
 0x1f3   :  { %360 = vbcast.lane.b32.xlu0 %v358_v25, 256  ;;  %v884_v41 = vpop.xlane.xlu0 %883  ;;  %v893_v63 = vpop.xlane.xlu1 %892  ;;  %v943_v23 = vrot.slane %v878_v2, %v2035_v33  ;;  %v955_v25 = vrot.slane %v887_v45, %v2035_v33 }
 0x1f4   :  { %v951_v24 = vrot.slane %v884_v41, %v2035_v33 }
 0x1f5   :  { %v1004_v36 = vsel %vm244_vm1, %v947_v22, %v943_v23 }
 0x1f6   :  { %353 = vbcast.lane.b32.xlu1 %v351_v55, 256 }
 0x1f7   :  { %367 = vbcast.lane.b32.xlu0 %v365_v27, 256  ;;  %v905_v47 = vpop.xlane.xlu0 %904  ;;  %v896_v14 = vpop.xlane.xlu1 %895  ;;  %v959_v27 = vrot.slane %v890_v53, %v2035_v33 }
 0x1f8   :  { %v979_v19 = vrot.slane %v905_v47, %v2035_v33  ;;  %v967_v7 = vrot.slane %v896_v14, %v2035_v33 }
 0x1fa   :  { %318 = vbcast.lane.b32.xlu1 %v316_v31, 256 }
 0x1fb   :  { %374 = vbcast.lane.b32.xlu0 %v372_v35, 256  ;;  %v908_v57 = vpop.xlane.xlu0 %907  ;;  %v899_v31 = vpop.xlane.xlu1 %898  ;;  %v1011_v35 = vsel %vm244_vm1, %v979_v19, %v975_v16 }
 0x1fc   :  { %v983_v55 = vrot.slane %v908_v57, %v2035_v33  ;;  %v971_v45 = vrot.slane %v899_v31, %v2035_v33 }
 0x1fe   :  { %325 = vbcast.lane.b32.xlu1 %v323_v37, 256  ;;  %v963_v37 = vrot.slane %v893_v63, %v2035_v33 }
 0x1ff   :  { %381 = vbcast.lane.b32.xlu0 %v379_v40, 256  ;;  %v911_v8 = vpop.xlane.xlu0 %910  ;;  %v1005_v40 = vsel %vm246_vm2, %v951_v24, %v1004_v36  ;;  %v923_v0 = vpop.xlane.xlu1 %922 }
 0x200   :  { %v987_v2 = vrot.slane %v911_v8, %v2035_v33  ;;  %v1003_v8 = vrot.slane %v923_v0, %v2035_v33 }
 0x202   :  { %332 = vbcast.lane.b32.xlu1 %v330_v43, 256  ;;  %v1006_v43 = vsel %vm248_vm3, %v955_v25, %v1005_v40 }
 0x203   :  { %388 = vbcast.lane.b32.xlu0 %v386_v46, 256  ;;  %v914_v20 = vpop.xlane.xlu0 %913  ;;  %v1012_v46 = vsel %vm246_vm2, %v983_v55, %v1011_v35  ;;  %v1007_v47 = vsel %vm250_vm4, %v959_v27, %v1006_v43 }
 0x204   :  { %v1013_v53 = vsel %vm248_vm3, %v987_v2, %v1012_v46 }
 0x206   :  { %339 = vbcast.lane.b32.xlu1 %v337_v48, 256  ;;  %v1008_v48 = vsel %vm252_vm5, %v963_v37, %v1007_v47 }
 0x207   :  { %395 = vbcast.lane.b32.xlu0 %v393_v52, 256  ;;  %v917_v41 = vpop.xlane.xlu0 %916  ;;  %v991_v52 = vrot.slane %v914_v20, %v2035_v33 }
 0x208   :  { %v995_v59 = vrot.slane %v917_v41, %v2035_v33 }
 0x209   :  { %v1014_v61 = vsel %vm250_vm4, %v991_v52, %v1013_v53 }
 0x20a   :  { %346 = vbcast.lane.b32.xlu1 %v344_v56, 256  ;;  %v1009_v56 = vsel %vm254_vm6, %v967_v7, %v1008_v48  ;;  %v1015_v1 = vsel %vm252_vm5, %v995_v59, %v1014_v61 }
 0x20b   :  { %v1010_v57 = vsel %vm256_vm8, %v971_v45, %v1009_v56  ;;  %v920_v60 = vpop.xlane.xlu0 %919 }
 0x20c   :  { %v999_v63 = vrot.slane %v920_v60, %v2035_v33 }
 0x20e   :  { %402 = vbcast.lane.b32.xlu1 %v400_v29, 256  ;;  %v2233_v29 = vsel %vm160_vm7, %v1010_v57, -1e+30  ;;  %v1016_v14 = vsel %vm254_vm6, %v999_v63, %v1015_v1 }
 0x20f   :  { %v1022_v4 = vsel %vm269_vm9, %v2233_v29, -inf  ;;  %v1017_v16 = vsel %vm256_vm8, %v1003_v8, %v1016_v14 }
 0x210   :  { %v2244_v49 = vsel %vm161_vm10, %v1017_v16, -1e+30 }
 0x211   :  { %v1025_v19 = vsel %vm269_vm9, %v2244_v49, -inf }
 0x226   :  { %1023 = vmax.xlane.f32.xlu0 %v1022_v4 }
 0x232   :  { %1026 = vmax.xlane.f32.xlu1 %v1025_v19 }
 0x260   :  { %v305_v20 = vpop.permute.xlu1 %304  ;;  %v298_v22 = vpop.permute.xlu0 %297 }
 0x261   :  { %v405_v23 = vmul.f32 %v1939_v9, %v305_v20  ;;  %v404_v24 = vmul.f32 %v1928_v5, %v298_v22 }
 0x263   :  { %v427_v33 = vsel %vm111_vm0, %v405_v23, 0.0  ;;  %v420_v25 = vsel %vm111_vm0, %v404_v24, 0.0 }
 0x264   :  { %v428_v55 = vrot.slane %v427_v33, 4  ;;  %v421_v27 = vrot.slane %v420_v25, 4  ;;  %v312_v31 = vpop.permute.xlu1 %311 }
 0x265   :  { %v406_v18 = vmul.f32 %v1926_v3, %v312_v31  ;;  %v361_v37 = vpop.permute.xlu0 %360 }
 0x266   :  { %v429_v35 = vadd.f32 %v428_v55, %v427_v33  ;;  %v422_v36 = vadd.f32 %v421_v27, %v420_v25  ;;  %v413_v7 = vmul.f32 %v1946_v17, %v361_v37 }
 0x267   :  { %v434_v40 = vsel %vm111_vm0, %v406_v18, 0.0 }
 0x268   :  { %v430_v2 = vrot.slane %v429_v35, 2  ;;  %v423_v41 = vrot.slane %v422_v36, 2  ;;  %v435_v43 = vrot.slane %v434_v40, 4  ;;  %v354_v45 = vpop.permute.xlu1 %353  ;;  %v483_v46 = vsel %vm111_vm0, %v413_v7, 0.0 }
 0x269   :  { %v412_v47 = vmul.f32 %v1941_v11, %v354_v45  ;;  %v484_v52 = vrot.slane %v483_v46, 4  ;;  %v368_v53 = vpop.permute.xlu0 %367 }
 0x26a   :  { %v436_v48 = vadd.f32 %v435_v43, %v434_v40  ;;  %v414_v57 = vmul.f32 %v1971_v34, %v368_v53  ;;  %v431_v59 = vadd.f32 %v430_v2, %v429_v35  ;;  %v424_v60 = vadd.f32 %v423_v41, %v422_v36 }
 0x26b   :  { %v476_v56 = vsel %vm111_vm0, %v412_v47, 0.0  ;;  %v485_v61 = vadd.f32 %v484_v52, %v483_v46 }
 0x26c   :  { %v319_v63 = vpop.permute.xlu1 %318  ;;  %v437_v0 = vrot.slane %v436_v48, 2  ;;  %v477_v1 = vrot.slane %v476_v56, 4  ;;  %v490_v4 = vsel %vm111_vm0, %v414_v57, 0.0  ;;  %v432_v22 = vrot.slane %v431_v59, 1 }
 0x26d   :  { %v407_v8 = vmul.f32 %v1944_v15, %v319_v63  ;;  %v375_v14 = vpop.permute.xlu0 %374  ;;  %v486_v16 = vrot.slane %v485_v61, 2  ;;  %v491_v24 = vrot.slane %v490_v4, 4  ;;  %v425_v55 = vrot.slane %v424_v60, 1 }
 0x26e   :  { %v415_v20 = vmul.f32 %v1979_v42, %v375_v14  ;;  %v478_v23 = vadd.f32 %v477_v1, %v476_v56  ;;  %v438_v27 = vadd.f32 %v437_v0, %v436_v48  ;;  %v433_v41 = vadd.f32 %v432_v22, %v431_v59 }
 0x26f   :  { %v441_v19 = vsel %vm111_vm0, %v407_v8, 0.0  ;;  %v487_v40 = vadd.f32 %v486_v16, %v485_v61  ;;  %v492_v45 = vadd.f32 %v491_v24, %v490_v4  ;;  %v426_v52 = vadd.f32 %v425_v55, %v424_v60 }
 0x270   :  { %v442_v33 = vrot.slane %v441_v19, 4  ;;  %v326_v25 = vpop.permute.xlu1 %325  ;;  %v497_v31 = vsel %vm111_vm0, %v415_v20, 0.0  ;;  %v479_v43 = vrot.slane %v478_v23, 2  ;;  %v439_v53 = vrot.slane %v438_v27, 1 }
 0x271   :  { %v408_v18 = vmul.f32 %v1967_v30, %v326_v25  ;;  %v498_v36 = vrot.slane %v497_v31, 4  ;;  %v382_v37 = vpop.permute.xlu0 %381  ;;  %v488_v8 = vrot.slane %v487_v40, 1  ;;  %v493_v4 = vrot.slane %v492_v45, 2 }
 0x272   :  { %v443_v35 = vadd.f32 %v442_v33, %v441_v19  ;;  %v416_v2 = vmul.f32 %v1999_v54, %v382_v37  ;;  %v480_v16 = vadd.f32 %v479_v43, %v478_v23  ;;  %v562_v22 = vsel %vm244_vm1, %v433_v41, %v426_v52 }
 0x273   :  { %v448_v7 = vsel %vm111_vm0, %v408_v18, 0.0  ;;  %v499_v63 = vadd.f32 %v498_v36, %v497_v31  ;;  %v440_v25 = vadd.f32 %v439_v53, %v438_v27  ;;  %v489_v37 = vadd.f32 %v488_v8, %v487_v40 }
 0x274   :  { %v449_v46 = vrot.slane %v448_v7, 4  ;;  %v333_v47 = vpop.permute.xlu1 %332  ;;  %v504_v48 = vsel %vm111_vm0, %v416_v2, 0.0  ;;  %v444_v57 = vrot.slane %v443_v35, 2  ;;  %v481_v23 = vrot.slane %v480_v16, 1 }
 0x275   :  { %v409_v56 = vmul.f32 %v1975_v38, %v333_v47  ;;  %v505_v1 = vrot.slane %v504_v48, 4  ;;  %v389_v61 = vpop.permute.xlu0 %388  ;;  %v500_v31 = vrot.slane %v499_v63, 2  ;;  %v494_v43 = vadd.f32 %v493_v4, %v492_v45 }
 0x276   :  { %v450_v0 = vadd.f32 %v449_v46, %v448_v7  ;;  %v417_v59 = vmul.f32 %v2007_v62, %v389_v61  ;;  %v445_v55 = vadd.f32 %v444_v57, %v443_v35 }
 0x277   :  { %v455_v14 = vsel %vm111_vm0, %v409_v56, 0.0  ;;  %v506_v20 = vadd.f32 %v505_v1, %v504_v48  ;;  %v501_v53 = vadd.f32 %v500_v31, %v499_v63 }
 0x278   :  { %v451_v19 = vrot.slane %v450_v0, 2  ;;  %v340_v60 = vpop.permute.xlu1 %339  ;;  %v456_v24 = vrot.slane %v455_v14, 4  ;;  %v511_v33 = vsel %vm111_vm0, %v417_v59, 0.0  ;;  %v446_v35 = vrot.slane %v445_v55, 1 }
 0x279   :  { %v396_v36 = vpop.permute.xlu0 %395  ;;  %v512_v2 = vrot.slane %v511_v33, 4  ;;  %v410_v46 = vmul.f32 %v1995_v50, %v340_v60  ;;  %v507_v47 = vrot.slane %v506_v20, 2 }
 0x27a   :  { %v452_v18 = vadd.f32 %v451_v19, %v450_v0  ;;  %v457_v7 = vadd.f32 %v456_v24, %v455_v14  ;;  %v418_v48 = vmul.f32 %v2021_v12, %v396_v36  ;;  %v482_v14 = vadd.f32 %v481_v23, %v480_v16 }
 0x27b   :  { %v513_v52 = vadd.f32 %v512_v2, %v511_v33  ;;  %v462_v1 = vsel %vm111_vm0, %v410_v46, 0.0  ;;  %v508_v24 = vadd.f32 %v507_v47, %v506_v20  ;;  %v495_v46 = vrot.slane %v494_v43, 1 }
 0x27c   :  { %v347_v56 = vpop.permute.xlu1 %346  ;;  %v458_v41 = vrot.slane %v457_v7, 2  ;;  %v453_v57 = vrot.slane %v452_v18, 1  ;;  %v463_v40 = vrot.slane %v462_v1, 4  ;;  %v518_v8 = vsel %vm111_vm0, %v418_v48, 0.0 }
 0x27d   :  { %v411_v27 = vmul.f32 %v2003_v58, %v347_v56  ;;  %v514_v61 = vrot.slane %v513_v52, 2  ;;  %v519_v4 = vrot.slane %v518_v8, 4  ;;  %v563_v47 = vsel %vm246_vm2, %v440_v25, %v562_v22 }
 0x27e   :  { %v459_v0 = vadd.f32 %v458_v41, %v457_v7  ;;  %v464_v59 = vadd.f32 %v463_v40, %v462_v1  ;;  %v447_v7 = vadd.f32 %v446_v35, %v445_v55  ;;  %v502_v41 = vrot.slane %v501_v53, 1 }
 0x27f   :  { %v469_v45 = vsel %vm111_vm0, %v411_v27, 0.0  ;;  %v515_v36 = vadd.f32 %v514_v61, %v513_v52  ;;  %v520_v31 = vadd.f32 %v519_v4, %v518_v8  ;;  %v454_v28 = vadd.f32 %v453_v57, %v452_v18 }
 0x280   :  { %v470_v19 = vrot.slane %v469_v45, 4  ;;  %v403_v60 = vpop.permute.xlu1 %402  ;;  %v460_v33 = vrot.slane %v459_v0, 1  ;;  %v465_v63 = vrot.slane %v464_v59, 2  ;;  %v509_v40 = vrot.slane %v508_v24, 1 }
 0x281   :  { %v419_v2 = vmul.f32 %v2017_v6, %v403_v60  ;;  %v521_v16 = vrot.slane %v520_v31, 2  ;;  %v516_v20 = vrot.slane %v515_v36, 1  ;;  %v569_v8 = vsel %vm244_vm1, %v489_v37, %v482_v14 }
 0x282   :  { %v471_v56 = vadd.f32 %v470_v19, %v469_v45  ;;  %v466_v27 = vadd.f32 %v465_v63, %v464_v59  ;;  %v461_v12 = vadd.f32 %v460_v33, %v459_v0  ;;  %v496_v55 = vadd.f32 %v495_v46, %v494_v43 }
 0x283   :  { %v525_v48 = vsel %vm111_vm0, %v419_v2, 0.0  ;;  %v522_v61 = vadd.f32 %v521_v16, %v520_v31  ;;  %v503_v35 = vadd.f32 %v502_v41, %v501_v53  ;;  %v564_v18 = vsel %vm248_vm3, %v447_v7, %v563_v47 }
 0x284   :  { %v472_v23 = vrot.slane %v471_v56, 2  ;;  %v526_v1 = vrot.slane %v525_v48, 4  ;;  %v467_v52 = vrot.slane %v466_v27, 1  ;;  %v510_v19 = vadd.f32 %v509_v40, %v508_v24 }
 0x285   :  { %v523_v57 = vrot.slane %v522_v61, 1  ;;  %v565_v0 = vsel %vm250_vm4, %v454_v28, %v564_v18  ;;  %v517_v33 = vadd.f32 %v516_v20, %v515_v36  ;;  %v570_v63 = vsel %vm246_vm2, %v496_v55, %v569_v8  ;;  %v537_v20 = vld [vmem:[%s2463_s6] sm:$0xff] }
 0x286   :  { %v473_v60 = vadd.f32 %v472_v23, %v471_v56  ;;  %v527_v6 = vadd.f32 %v526_v1, %v525_v48  ;;  %v468_v59 = vadd.f32 %v467_v52, %v466_v27  ;;  %v566_v25 = vsel %vm252_vm5, %v461_v12, %v565_v0 }
 0x287   :  { %v524_v31 = vadd.f32 %v523_v57, %v522_v61  ;;  %v571_v43 = vsel %vm248_vm3, %v503_v35, %v570_v63  ;;  %v1594_v35 = vld [vmem:[%s2464_s5] ss:$0 sm:$0xff] }
 0x288   :  { %v528_v45 = vrot.slane %v527_v6, 2  ;;  %v474_v4 = vrot.slane %v473_v60, 1  ;;  %v567_v37 = vsel %vm254_vm6, %v468_v59, %v566_v25  ;;  %v572_v24 = vsel %vm250_vm4, %v510_v19, %v571_v43 }
 0x28a   :  { %v529_v2 = vadd.f32 %v528_v45, %v527_v6  ;;  %v475_v22 = vadd.f32 %v474_v4, %v473_v60  ;;  %v573_v6 = vsel %vm252_vm5, %v517_v33, %v572_v24 }
 0x28b   :  { %v574_v36 = vsel %vm254_vm6, %v524_v31, %v573_v6  ;;  %v1621_v6 = vld [vmem:[%s2462_s4 + $0x38] sm:$0xff] }
 0x28c   :  { %v530_v53 = vrot.slane %v529_v2, 1  ;;  %v568_v14 = vsel %vm256_vm8, %v475_v22, %v567_v37 }
 0x28d   :  { %1782 = vmatprep.mubr.msk.f32.mxu0 %vm111_vm0, %v568_v14 }
 0x28e   :  { %v531_v28 = vadd.f32 %v530_v53, %v529_v2 }
 0x290   :  { %v575_v12 = vsel %vm256_vm8, %v531_v28, %v574_v36  ;;  %v1620_v28 = vld [vmem:[%s2462_s4 + $0x30] sm:$0xff] }
 0x291   :  { %1783 = vmatmul.mubr.msk.f32.vlgmr.msra.gmra.mrb[0].mxu0 %vm111_vm0, %v575_v12  ;;  %v1826_v36 = vpack.c.bf16 %v1621_v6, %v1620_v28 }
 0x2b3   :  { %v1024_v46 = vpop.xlane.xlu0 %1023 }
 0x2b4   :  { %v1028_v56 = vsub.f32 %v2233_v29, %v1024_v46  ;;  %v538_v29 = vld [vmem:[%s2463_s6 + $0x8] sm:$0xff] }
 0x2b5   :  { %v1818_v47 = vpack.c.bf16 %v538_v29, %v537_v20 }
 0x2b6   :  { %v1030_v7 = vmul.f32 1.442695, %v1028_v56 }
 0x2b7   :  { %1819 = vmatprep.subr.bf16.mxu1 %v1818_v47 }
 0x2b8   :  { %1846 = vpow2.f32 %v1030_v7  ;;  %1821 = vmatpush3.bf16.msra.mxu1 %v1818_v47 }
 0x2bf   :  { %v1027_v41 = vpop.xlane.xlu1 %1026 }
 0x2c0   :  { %v1029_v48 = vsub.f32 %v2244_v49, %v1027_v41 }
 0x2c2   :  { %v1032_v27 = vmul.f32 1.442695, %v1029_v48  ;;  %v1847_v16 = vpop.eup %1846 }
 0x2c3   :  { %v1034_v23 = vsel %vm269_vm9, %v1847_v16, 0.0 }
 0x2c4   :  { %1848 = vpow2.f32 %v1032_v27  ;;  %1035 = vadd.xlane.f32.xlu0 %v1034_v23 }
 0x2ce   :  { %v1849_v1 = vpop.eup %1848 }
 0x2cf   :  { %v1037_v40 = vsel %vm269_vm9, %v1849_v1, 0.0 }
 0x2d0   :  { %1038 = vadd.xlane.f32.xlu0 %v1037_v40 }
 0x351   :  { %v1036_v49 = vpop.xlane.xlu0 %1035 }
 0x352   :  { %1850 = vrcp.f32 %v1036_v49 }
 0x35c   :  { %v1851_v52 = vpop.eup %1850 }
 0x35d   :  { %v1039_v61 = vpop.xlane.xlu0 %1038  ;;  %v1042_v60 = vmul.f32 %v1851_v52, %v1847_v16 }
 0x35e   :  { %1852 = vrcp.f32 %v1039_v61 }
 0x35f   :  { %v1054_v8 = vrot.slane %v1042_v60, %v2152_v10  ;;  %v1047_v55 = vrot.slane %v1042_v60, %v2155_v13  ;;  %v1061_v57 = vrot.slane %v1042_v60, %v2161_v21  ;;  %v1068_v31 = vrot.slane %v1042_v60, %v2168_v26 }
 0x360   :  { %v1075_v43 = vrot.slane %v1042_v60, %v2173_v32 }
 0x361   :  { %1056 = vbcast.lane.b32.xlu1 %v1054_v8, 256  ;;  %1049 = vbcast.lane.b32.xlu0 %v1047_v55, 256 }
 0x364   :  { %v1784_v18 = vpop.f32.mrb[0].mxu0 }
 0x365   :  { %v652_v45 = vadd.f32 %v1784_v18, %v1594_v35  ;;  %v646_v59 = vpop.f32.mrb[1].mxu0  ;;  %1063 = vbcast.lane.b32.xlu1 %v1061_v57, 256 }
 0x366   :  { %v647_v4 = vadd.f32 %v1594_v35, %v646_v59 }
 0x367   :  { %v656_v2 = vmax.f32 %v652_v45, 0.0 }
 0x368   :  { %v1853_v19 = vpop.eup %1852  ;;  %v655_v0 = vmax.f32 %v647_v4, 0.0 }
 0x369   :  { %v1043_v33 = vmul.f32 %v1853_v19, %v1849_v1 }
 0x36a   :  { %1789 = vmatprep.mubr.msk.f32.mxu1 %vm663_vm11, %v655_v0 }
 0x36b   :  { %1790 = vmatmul.mubr.msk.f32.vlgmr.msra.gmra.mrb[0].mxu1 %vm663_vm11, %v656_v2  ;;  %v1110_v22 = vrot.slane %v1043_v33, %v2152_v10  ;;  %v1103_v25 = vrot.slane %v1043_v33, %v2155_v13  ;;  %v1117_v63 = vrot.slane %v1043_v33, %v2161_v21  ;;  %v1124_v37 = vrot.slane %v1043_v33, %v2168_v26 }
 0x36c   :  { %v1131_v53 = vrot.slane %v1043_v33, %v2173_v32  ;;  %v1082_v10 = vrot.slane %v1042_v60, %v2178_v39  ;;  %v1138_v13 = vrot.slane %v1043_v33, %v2178_v39  ;;  %v1089_v21 = vrot.slane %v1042_v60, %v2183_v44  ;;  %v1618_v32 = vld [vmem:[%s2462_s4 + $0x20] sm:$0xff]  ;;  %v1619_v39 = vld [vmem:[%s2462_s4 + $0x28] sm:$0xff] }
 0x36d   :  { %1112 = vbcast.lane.b32.xlu0 %v1110_v22, 256  ;;  %1105 = vbcast.lane.b32.xlu1 %v1103_v25, 256  ;;  %v1145_v14 = vrot.slane %v1043_v33, %v2183_v44  ;;  %v1096_v26 = vrot.slane %v1042_v60, %v2188_v51  ;;  %v1152_v24 = vrot.slane %v1043_v33, %v2188_v51 }
 0x36e   :  { %v1822_v44 = vpack.c.bf16 %v1619_v39, %v1618_v32 }
 0x370   :  { %1823 = vmatprep.subr.bf16.mxu1 %v1822_v44 }
 0x371   :  { %1119 = vbcast.lane.b32.xlu0 %v1117_v63, 256  ;;  %1070 = vbcast.lane.b32.xlu1 %v1068_v31, 256 }
 0x372   :  { %1825 = vmatpush3.bf16.msra.mxu1 %v1822_v44 }
 0x373   :  { %1827 = vmatprep.subr.bf16.mxu1 %v1826_v36 }
 0x375   :  { %1126 = vbcast.lane.b32.xlu0 %v1124_v37, 256  ;;  %1077 = vbcast.lane.b32.xlu1 %v1075_v43, 256 }
 0x376   :  { %1829 = vmatpush3.bf16.msra.mxu1 %v1826_v36 }
 0x379   :  { %1133 = vbcast.lane.b32.xlu0 %v1131_v53, 256  ;;  %1084 = vbcast.lane.b32.xlu1 %v1082_v10, 256 }
 0x37d   :  { %1140 = vbcast.lane.b32.xlu0 %v1138_v13, 256  ;;  %1091 = vbcast.lane.b32.xlu1 %v1089_v21, 256 }
 0x381   :  { %1147 = vbcast.lane.b32.xlu0 %v1145_v14, 256  ;;  %1098 = vbcast.lane.b32.xlu1 %v1096_v26, 256 }
 0x385   :  { %1154 = vbcast.lane.b32.xlu1 %v1152_v24, 256 }
 0x3d3   :  { %v1057_v51 = vpop.permute.xlu1 %1056  ;;  %v1050_v12 = vpop.permute.xlu0 %1049 }
 0x3d4   :  { %v1157_v46 = vmul.f32 %v1939_v9, %v1057_v51  ;;  %v1156_v56 = vmul.f32 %v1928_v5, %v1050_v12 }
 0x3d6   :  { %v1179_v7 = vsel %vm111_vm0, %v1157_v46, 0.0  ;;  %v1172_v41 = vsel %vm111_vm0, %v1156_v56, 0.0 }
 0x3d7   :  { %v1064_v48 = vpop.permute.xlu1 %1063  ;;  %v1180_v16 = vrot.slane %v1179_v7, 4  ;;  %v1173_v23 = vrot.slane %v1172_v41, 4 }
 0x3d8   :  { %v1158_v27 = vmul.f32 %v1926_v3, %v1064_v48 }
 0x3d9   :  { %v1181_v40 = vadd.f32 %v1180_v16, %v1179_v7  ;;  %v1174_v20 = vadd.f32 %v1173_v23, %v1172_v41 }
 0x3da   :  { %v1186_v1 = vsel %vm111_vm0, %v1158_v27, 0.0 }
 0x3db   :  { %v1187_v49 = vrot.slane %v1186_v1, 4  ;;  %v1182_v52 = vrot.slane %v1181_v40, 2  ;;  %v1175_v60 = vrot.slane %v1174_v20, 2 }
 0x3dd   :  { %v1188_v35 = vadd.f32 %v1187_v49, %v1186_v1  ;;  %v1183_v59 = vadd.f32 %v1182_v52, %v1181_v40  ;;  %v1176_v19 = vadd.f32 %v1175_v60, %v1174_v20 }
 0x3df   :  { %v1106_v29 = vpop.permute.xlu1 %1105  ;;  %v1113_v47 = vpop.permute.xlu0 %1112  ;;  %v1189_v33 = vrot.slane %v1188_v35, 2  ;;  %v1177_v43 = vrot.slane %v1176_v19, 1 }
 0x3e0   :  { %v1164_v9 = vmul.f32 %v1941_v11, %v1106_v29  ;;  %v1165_v5 = vmul.f32 %v1946_v17, %v1113_v47 }
 0x3e1   :  { %v1190_v26 = vadd.f32 %v1189_v33, %v1188_v35  ;;  %v1178_v51 = vadd.f32 %v1177_v43, %v1176_v19  ;;  %v2475_v33 = vld [vmem:[#allocation3_spill] sm:$0xff] }
 0x3e2   :  { %v1228_v61 = vsel %vm111_vm0, %v1164_v9, 0.0  ;;  %v1235_v8 = vsel %vm111_vm0, %v1165_v5, 0.0 }
 0x3e3   :  { %v1071_v3 = vpop.permute.xlu1 %1070  ;;  %v1120_v55 = vpop.permute.xlu0 %1119  ;;  %v1229_v57 = vrot.slane %v1228_v61, 4  ;;  %v1236_v4 = vrot.slane %v1235_v8, 4  ;;  %v1191_v48 = vrot.slane %v1190_v26, 1 }
 0x3e4   :  { %v1159_v18 = vmul.f32 %v1944_v15, %v1071_v3  ;;  %v1166_v45 = vmul.f32 %v1971_v34, %v1120_v55  ;;  %v1184_v15 = vrot.slane %v1183_v59, 1 }
 0x3e5   :  { %v1230_v63 = vadd.f32 %v1229_v57, %v1228_v61  ;;  %v1237_v37 = vadd.f32 %v1236_v4, %v1235_v8  ;;  %v1192_v60 = vadd.f32 %v1191_v48, %v1190_v26 }
 0x3e6   :  { %v1193_v11 = vsel %vm111_vm0, %v1159_v18, 0.0  ;;  %v1242_v22 = vsel %vm111_vm0, %v1166_v45, 0.0  ;;  %v1185_v44 = vadd.f32 %v1184_v15, %v1183_v59 }
 0x3e7   :  { %v1078_v17 = vpop.permute.xlu1 %1077  ;;  %v1127_v0 = vpop.permute.xlu0 %1126  ;;  %v1194_v2 = vrot.slane %v1193_v11, 4  ;;  %v1243_v53 = vrot.slane %v1242_v22, 4  ;;  %v1238_v6 = vrot.slane %v1237_v37, 2 }
 0x3e8   :  { %v1160_v25 = vmul.f32 %v1967_v30, %v1078_v17  ;;  %v1167_v31 = vmul.f32 %v1979_v42, %v1127_v0  ;;  %v1231_v30 = vrot.slane %v1230_v63, 2  ;;  %v1318_v49 = vsel %vm244_vm1, %v1185_v44, %v1178_v51 }
 0x3e9   :  { %v1195_v24 = vadd.f32 %v1194_v2, %v1193_v11  ;;  %v1244_v12 = vadd.f32 %v1243_v53, %v1242_v22  ;;  %v1239_v20 = vadd.f32 %v1238_v6, %v1237_v37 }
 0x3ea   :  { %v1200_v34 = vsel %vm111_vm0, %v1160_v25, 0.0  ;;  %v1249_v13 = vsel %vm111_vm0, %v1167_v31, 0.0 }
 0x3eb   :  { %v1201_v10 = vrot.slane %v1200_v34, 4  ;;  %v1085_v21 = vpop.permute.xlu1 %1084  ;;  %v1134_v14 = vpop.permute.xlu0 %1133  ;;  %v1250_v32 = vrot.slane %v1249_v13, 4  ;;  %v1196_v27 = vrot.slane %v1195_v24, 2  ;;  %v1245_v9 = vrot.slane %v1244_v12, 2 }
 0x3ec   :  { %v1161_v39 = vmul.f32 %v1975_v38, %v1085_v21  ;;  %v1168_v42 = vmul.f32 %v1999_v54, %v1134_v14  ;;  %v1232_v38 = vadd.f32 %v1231_v30, %v1230_v63  ;;  %v1240_v59 = vrot.slane %v1239_v20, 1 }
 0x3ed   :  { %v1202_v28 = vadd.f32 %v1201_v10, %v1200_v34  ;;  %v1251_v16 = vadd.f32 %v1250_v32, %v1249_v13  ;;  %v1197_v8 = vadd.f32 %v1196_v27, %v1195_v24  ;;  %v1246_v19 = vadd.f32 %v1245_v9, %v1244_v12 }
 0x3ee   :  { %v1207_v36 = vsel %vm111_vm0, %v1161_v39, 0.0  ;;  %v1256_v56 = vsel %vm111_vm0, %v1168_v42, 0.0  ;;  %v1233_v18 = vrot.slane %v1232_v38, 1 }
 0x3ef   :  { %v1208_v46 = vrot.slane %v1207_v36, 4  ;;  %v1092_v7 = vpop.permute.xlu1 %1091  ;;  %v1141_v41 = vpop.permute.xlu0 %1140  ;;  %v1257_v23 = vrot.slane %v1256_v56, 4  ;;  %v1203_v1 = vrot.slane %v1202_v28, 2  ;;  %v1252_v3 = vrot.slane %v1251_v16, 2 }
 0x3f0   :  { %v1162_v54 = vmul.f32 %v1995_v50, %v1092_v7  ;;  %v1169_v47 = vmul.f32 %v2007_v62, %v1141_v41  ;;  %v1198_v25 = vrot.slane %v1197_v8, 1  ;;  %v1234_v26 = vadd.f32 %v1233_v18, %v1232_v38 }
 0x3f1   :  { %v1209_v40 = vadd.f32 %v1208_v46, %v1207_v36  ;;  %v1258_v29 = vadd.f32 %v1257_v23, %v1256_v56  ;;  %v1204_v57 = vadd.f32 %v1203_v1, %v1202_v28  ;;  %v1253_v63 = vadd.f32 %v1252_v3, %v1251_v16 }
 0x3f2   :  { %v1214_v52 = vsel %vm111_vm0, %v1162_v54, 0.0  ;;  %v1263_v50 = vsel %vm111_vm0, %v1169_v47, 0.0  ;;  %v1247_v30 = vrot.slane %v1246_v19, 1  ;;  %v1199_v6 = vadd.f32 %v1198_v25, %v1197_v8 }
 0x3f3   :  { %v1210_v5 = vrot.slane %v1209_v40, 2  ;;  %v1099_v61 = vpop.permute.xlu1 %1098  ;;  %v1215_v55 = vrot.slane %v1214_v52, 4  ;;  %v1148_v35 = vpop.permute.xlu0 %1147  ;;  %v1259_v62 = vrot.slane %v1258_v29, 2  ;;  %v1264_v11 = vrot.slane %v1263_v50, 4 }
 0x3f4   :  { %v1163_v45 = vmul.f32 %v2003_v58, %v1099_v61  ;;  %v1170_v2 = vmul.f32 %v2475_v33, %v1148_v35  ;;  %v1205_v37 = vrot.slane %v1204_v57, 1  ;;  %v2476_v58 = vld [vmem:[#allocation2_spill] sm:$0xff]  ;;  %v1254_v36 = vrot.slane %v1253_v63, 1 }
 0x3f5   :  { %v1216_v4 = vadd.f32 %v1215_v55, %v1214_v52  ;;  %v1211_v17 = vadd.f32 %v1210_v5, %v1209_v40  ;;  %v1265_v15 = vadd.f32 %v1264_v11, %v1263_v50  ;;  %v1260_v10 = vadd.f32 %v1259_v62, %v1258_v29 }
 0x3f6   :  { %v1221_v0 = vsel %vm111_vm0, %v1163_v45, 0.0  ;;  %v1270_v43 = vsel %vm111_vm0, %v1170_v2, 0.0  ;;  %v1241_v46 = vadd.f32 %v1240_v59, %v1239_v20  ;;  %v1206_v56 = vadd.f32 %v1205_v37, %v1204_v57 }
 0x3f7   :  { %v1155_v22 = vpop.permute.xlu1 %1154  ;;  %v1217_v31 = vrot.slane %v1216_v4, 2  ;;  %v1222_v34 = vrot.slane %v1221_v0, 4  ;;  %v1266_v21 = vrot.slane %v1265_v15, 2  ;;  %v1271_v14 = vrot.slane %v1270_v43, 4 }
 0x3f8   :  { %v1171_v53 = vmul.f32 %v2476_v58, %v1155_v22  ;;  %v1212_v24 = vrot.slane %v1211_v17, 1  ;;  %v1261_v7 = vrot.slane %v1260_v10, 1  ;;  %v1319_v38 = vsel %vm246_vm2, %v1192_v60, %v1318_v49 }
 0x3f9   :  { %v1218_v13 = vadd.f32 %v1217_v31, %v1216_v4  ;;  %v1223_v32 = vadd.f32 %v1222_v34, %v1221_v0  ;;  %v1267_v42 = vadd.f32 %v1266_v21, %v1265_v15  ;;  %v1272_v44 = vadd.f32 %v1271_v14, %v1270_v43  ;;  %v1597_v0 = vld [vmem:[%s2465_s7] ss:$0 sm:$0xff]  ;;  %v1623_v31 = vld [vmem:[%s2463_s6 + $0x10] sm:$0xff]  ;;  %v1624_v15 = vld [vmem:[%s2463_s6 + $0x18] sm:$0xff] }
 0x3fa   :  { %v1277_v39 = vsel %vm111_vm0, %v1171_v53, 0.0  ;;  %v1213_v48 = vadd.f32 %v1212_v24, %v1211_v17  ;;  %v1248_v1 = vadd.f32 %v1247_v30, %v1246_v19  ;;  %v1320_v29 = vsel %vm248_vm3, %v1199_v6, %v1319_v38  ;;  %v1626_v53 = vld [vmem:[%s2464_s5 + $0x1] ss:$0 sm:$0xff] }
 0x3fb   :  { %v1219_v28 = vrot.slane %v1218_v13, 1  ;;  %v1224_v51 = vrot.slane %v1223_v32, 2  ;;  %v1278_v12 = vrot.slane %v1277_v39, 4  ;;  %v1273_v41 = vrot.slane %v1272_v44, 2  ;;  %v1629_v30 = vld [vmem:[%s2465_s7 + $0x1] ss:$0 sm:$0xff] }
 0x3fc   :  { %v1268_v27 = vrot.slane %v1267_v42, 1  ;;  %v1255_v47 = vadd.f32 %v1254_v36, %v1253_v63  ;;  %v1325_v52 = vsel %vm244_vm1, %v1241_v46, %v1234_v26  ;;  %v1262_v20 = vadd.f32 %v1261_v7, %v1260_v10 }
 0x3fd   :  { %v1225_v16 = vadd.f32 %v1224_v51, %v1223_v32  ;;  %v1279_v23 = vadd.f32 %v1278_v12, %v1277_v39  ;;  %v1220_v40 = vadd.f32 %v1219_v28, %v1218_v13  ;;  %v1274_v54 = vadd.f32 %v1273_v41, %v1272_v44 }
 0x3fe   :  { %v1321_v8 = vsel %vm250_vm4, %v1206_v56, %v1320_v29  ;;  %v1269_v3 = vadd.f32 %v1268_v27, %v1267_v42  ;;  %v1326_v49 = vsel %vm246_vm2, %v1248_v1, %v1325_v52  ;;  %v1830_v37 = vpack.c.bf16 %v1624_v15, %v1623_v31  ;;  %v771_v52 = vld [vmem:[%s2466_s3] sm:$0xff] }
 0x3ff   :  { %v1226_v9 = vrot.slane %v1225_v16, 1  ;;  %v1280_v5 = vrot.slane %v1279_v23, 2  ;;  %v1275_v61 = vrot.slane %v1274_v54, 1  ;;  %v1322_v18 = vsel %vm252_vm5, %v1213_v48, %v1321_v8  ;;  %v772_v8 = vld [vmem:[%s2466_s3 + $0x8] sm:$0xff] }
 0x400   :  { %v1323_v57 = vsel %vm254_vm6, %v1220_v40, %v1322_v18  ;;  %v1327_v50 = vsel %vm248_vm3, %v1255_v47, %v1326_v49  ;;  %1831 = vmatprep.subr.bf16.mxu0 %v1830_v37  ;;  %v1870_v46 = vmov 0   ;;  %vm1588_vm1 = vcmask 123904  }
 0x401   :  { %v1227_v55 = vadd.f32 %v1226_v9, %v1225_v16  ;;  %v1281_v35 = vadd.f32 %v1280_v5, %v1279_v23  ;;  %v1276_v60 = vadd.f32 %v1275_v61, %v1274_v54  ;;  %v1328_v62 = vsel %vm250_vm4, %v1262_v20, %v1327_v50  ;;  %1833 = vmatpush3.bf16.msra.mxu0 %v1830_v37  ;;  %v1632_v20 = vld [vmem:[%s2466_s3 + $0x10] sm:$0xff]  ;;  %v1633_v61 = vld [vmem:[%s2466_s3 + $0x18] sm:$0xff] }
 0x402   :  { %v1329_v11 = vsel %vm252_vm5, %v1269_v3, %v1328_v62  ;;  %1837 = vset.pattern.permute.xlu1 %v1870_v46  ;;  %1836 = vset.pattern.permute.xlu0 %v1870_v46  ;;  %v2477_v62 = vld [vmem:[#allocation4_spill] sm:$0xff] }
 0x403   :  { %v1282_v45 = vrot.slane %v1281_v35, 1  ;;  %v1324_v59 = vsel %vm256_vm8, %v1227_v55, %v1323_v57  ;;  %v1330_v19 = vsel %vm254_vm6, %v1276_v60, %v1329_v11 }
 0x404   :  { %1800 = vmatprep.mubr.msk.f32.mxu1 %vm111_vm0, %v1324_v59 }
 0x405   :  { %v1283_v4 = vadd.f32 %v1282_v45, %v1281_v35 }
 0x407   :  { %v1331_v17 = vsel %vm256_vm8, %v1283_v4, %v1330_v19 }
 0x408   :  { %1801 = vmatmul.mubr.msk.f32.vlgmr.msra.gmra.mrb[2].mxu1 %vm111_vm0, %v1331_v17  ;;  %v1871_v17 = vmov 0.0   ;;  %vm1586_vm0 = vcmask 1040384  }
 0x43e   :  { %v1791_v33 = vpop.f32.mrb[0].mxu1 }
 0x43f   :  { %v2390_v2 = vadd.f32 %v1791_v33, %v1597_v0  ;;  %v736_v22 = vpop.f32.mrb[1].mxu1 }
 0x440   :  { %v2392_v25 = vadd.f32 %v1597_v0, %v736_v22 }
 0x441   :  { %v748_v12 = vsel %vm269_vm9, %v2390_v2, -inf }
 0x442   :  { %v745_v63 = vsel %vm269_vm9, %v2392_v25, -inf }
 0x443   :  { %746 = vmax.xlane.f32.xlu1 %v745_v63 }
 0x4d0   :  { %v2402_v34 = vpop.xlane.xlu1 %746 }
 0x4d1   :  { %v751_v43 = vsub.f32 %v2392_v25, %v2402_v34 }
 0x4d3   :  { %v753_v58 = vmul.f32 1.442695, %v751_v43 }
 0x4d5   :  { %1854 = vpow2.f32 %v753_v58 }
 0x4db   :  { %v1802_v10 = vpop.f32.mrb[2].mxu1 }
 0x4dc   :  { %v1408_v13 = vadd.f32 %v1802_v10, %v1626_v53  ;;  %v1402_v21 = vpop.f32.mrb[3].mxu1 }
 0x4dd   :  { %v1403_v26 = vadd.f32 %v1626_v53, %v1402_v21 }
 0x4de   :  { %v1412_v39 = vmax.f32 %v1408_v13, 0.0 }
 0x4df   :  { %v1855_v14 = vpop.eup %1854  ;;  %v1411_v32 = vmax.f32 %v1403_v26, 0.0 }
 0x4e0   :  { %v757_v24 = vsel %vm269_vm9, %v1855_v14, 0.0 }
 0x4e1   :  { %758 = vadd.xlane.f32.xlu1 %v757_v24  ;;  %1807 = vmatprep.mubr.msk.f32.mxu0 %vm663_vm11, %v1411_v32 }
 0x4e2   :  { %1808 = vmatmul.mubr.msk.f32.vlgmr.msra.gmra.mrb[2].mxu0 %vm663_vm11, %v1412_v39 }
 0x56e   :  { %v759_v3 = vpop.xlane.xlu1 %758 }
 0x5b5   :  { %v1809_v28 = vpop.f32.mrb[2].mxu0 }
 0x5b6   :  { %v2415_v42 = vadd.f32 %v1809_v28, %v1629_v30  ;;  %v1491_v44 = vpop.f32.mrb[3].mxu0 }
 0x5b7   :  { %v2417_v6 = vadd.f32 %v1629_v30, %v1491_v44 }
 0x5b8   :  { %v1503_v36 = vsel %vm269_vm9, %v2415_v42, -inf }
 0x5b9   :  { %1504 = vmax.xlane.f32.xlu0 %v1503_v36  ;;  %v1500_v51 = vsel %vm269_vm9, %v2417_v6, -inf }
 0x5bd   :  { %1501 = vmax.xlane.f32.xlu0 %v1500_v51 }
 0x5c1   :  { %749 = vmax.xlane.f32.xlu0 %v748_v12 }
 0x646   :  { %v1505_v56 = vpop.xlane.xlu0 %1504 }
 0x647   :  { %v1507_v7 = vsub.f32 %v2415_v42, %v1505_v56 }
 0x649   :  { %v1510_v41 = vmul.f32 1.442695, %v1507_v7 }
 0x64a   :  { %v1502_v48 = vpop.xlane.xlu0 %1501 }
 0x64b   :  { %1856 = vpow2.f32 %v1510_v41  ;;  %v1506_v27 = vsub.f32 %v2417_v6, %v1502_v48 }
 0x64d   :  { %v1508_v16 = vmul.f32 1.442695, %v1506_v27 }
 0x64e   :  { %v750_v23 = vpop.xlane.xlu0 %749 }
 0x64f   :  { %1858 = vpow2.f32 %v1508_v16  ;;  %v752_v38 = vsub.f32 %v2390_v2, %v750_v23 }
 0x651   :  { %v755_v1 = vmul.f32 1.442695, %v752_v38 }
 0x653   :  { %1860 = vpow2.f32 %v755_v1 }
 0x654   :  { %1862 = vlog2.f32 %v759_v3 }
 0x655   :  { %v1857_v40 = vpop.eup %1856 }
 0x656   :  { %v1515_v54 = vsel %vm269_vm9, %v1857_v40, 0.0 }
 0x657   :  { %1516 = vadd.xlane.f32.xlu0 %v1515_v54 }
 0x659   :  { %v1859_v29 = vpop.eup %1858 }
 0x65a   :  { %v1512_v47 = vsel %vm269_vm9, %v1859_v29, 0.0 }
 0x65b   :  { %1513 = vadd.xlane.f32.xlu0 %v1512_v47 }
 0x65d   :  { %v1861_v9 = vpop.eup %1860 }
 0x65e   :  { %v760_v5 = vsel %vm269_vm9, %v1861_v9, 0.0  ;;  %v1863_v35 = vpop.eup %1862 }
 0x65f   :  { %761 = vadd.xlane.f32.xlu1 %v760_v5  ;;  %v764_v49 = vmul.f32 0.6931472, %v1863_v35 }
 0x661   :  { %v767_v57 = vadd.f32 %v764_v49, %v2402_v34 }
 0x663   :  { %v769_v4 = vsub.f32 %v2392_v25, %v767_v57 }
 0x670   :  { %774 = vperm.xlu1 %1837, %v771_v52  }
 0x671   :  { %1530 = vperm.xlu0 %1836, %v1632_v20  }
 0x674   :  { %1533 = vperm.xlu1 %1837, %v1633_v61  }
 0x678   :  { %777 = vperm.xlu1 %1837, %v772_v8  }
 0x6e4   :  { %v1517_v55 = vpop.xlane.xlu0 %1516 }
 0x6e5   :  { %1864 = vlog2.f32 %v1517_v55 }
 0x6e8   :  { %v1514_v18 = vpop.xlane.xlu0 %1513 }
 0x6e9   :  { %1866 = vlog2.f32 %v1514_v18 }
 0x6ec   :  { %v762_v60 = vpop.xlane.xlu1 %761 }
 0x6ed   :  { %1868 = vlog2.f32 %v762_v60 }
 0x6ef   :  { %v1865_v50 = vpop.eup %1864 }
 0x6f0   :  { %v1521_v45 = vmul.f32 0.6931472, %v1865_v50  ;;  %v775_v59 = vpop.permute.xlu1 %774  ;;  %v1531_v11 = vpop.permute.xlu0 %1530 }
 0x6f1   :  { %vm779_vm12 = vcmp.eq.s32.totalorder %v2477_v62, %v775_v59  ;;  %vm1535_vm13 = vcmp.eq.s32.totalorder %v2477_v62, %v1531_v11 }
 0x6f2   :  { %v1523_v19 = vadd.f32 %v1521_v45, %v1505_v56  ;;  %v1600_v0 = vsel %vm779_vm12, 1.0, %v1871_v17  ;;  %v1634_v58 = vsel %vm1535_vm13, 1.0, %v1871_v17 }
 0x6f3   :  { %v1867_v33 = vpop.eup %1866  ;;  %v785_v22 = vmul.f32 %v1600_v0, %v769_v4 }
 0x6f4   :  { %v1519_v63 = vmul.f32 0.6931472, %v1867_v33  ;;  %v1534_v31 = vpop.permute.xlu1 %1533  ;;  %v1525_v15 = vsub.f32 %v2415_v42, %v1523_v19 }
 0x6f5   :  { %vm1536_vm14 = vcmp.eq.s32.totalorder %v2477_v62, %v1534_v31  ;;  %v787_v37 = vsel %vm269_vm9, %v785_v22, 0.0 }
 0x6f6   :  { %v1522_v34 = vadd.f32 %v1519_v63, %v1502_v48  ;;  %v1635_v43 = vsel %vm1536_vm14, 1.0, %v1871_v17  ;;  %788 = vadd.xlane.f32.xlu1 %v787_v37 }
 0x6f7   :  { %v1869_v25 = vpop.eup %1868  ;;  %v1542_v53 = vmul.f32 %v1635_v43, %v1525_v15 }
 0x6f8   :  { %v766_v10 = vmul.f32 0.6931472, %v1869_v25  ;;  %v778_v13 = vpop.permute.xlu1 %777  ;;  %v1524_v21 = vsub.f32 %v2417_v6, %v1522_v34 }
 0x6f9   :  { %v1546_v14 = vsel %vm269_vm9, %v1542_v53, 0.0  ;;  %vm780_vm15 = vcmp.eq.s32.totalorder %v2477_v62, %v778_v13 }
 0x6fa   :  { %v768_v26 = vadd.f32 %v766_v10, %v750_v23  ;;  %1547 = vadd.xlane.f32.xlu1 %v1546_v14  ;;  %v1541_v24 = vmul.f32 %v1634_v58, %v1524_v21  ;;  %v1601_v30 = vsel %vm780_vm15, 1.0, %v1871_v17 }
 0x6fc   :  { %v1543_v32 = vsel %vm269_vm9, %v1541_v24, 0.0  ;;  %v770_v39 = vsub.f32 %v2390_v2, %v768_v26 }
 0x6fd   :  { %1544 = vadd.xlane.f32.xlu0 %v1543_v32 }
 0x6fe   :  { %v786_v28 = vmul.f32 %v1601_v30, %v770_v39 }
 0x700   :  { %v790_v42 = vsel %vm269_vm9, %v786_v28, 0.0 }
 0x701   :  { %791 = vadd.xlane.f32.xlu1 %v790_v42 }
 0x783   :  { %v789_v44 = vpop.xlane.xlu1 %788 }
 0x784   :  { %v793_v36 = vsub.f32 0.0, %v789_v44 }
 0x786   :  { %795 = vxpose.xlu1.b32.start [1/2] (short) (narrow) %v793_v36, 8 }
 0x787   :  { %v1548_v6 = vpop.xlane.xlu1 %1547 }
 0x788   :  { %v1550_v56 = vsub.f32 0.0, %v1548_v6 }
 0x78a   :  { %v1545_v51 = vpop.xlane.xlu0 %1544 }
 0x78b   :  { %v1549_v12 = vsub.f32 0.0, %v1545_v51 }
 0x78d   :  { %1551 = vxpose.xlu0.b32.start [1/2] (short) (narrow) %v1549_v12, 8 }
 0x78e   :  { %v792_v46 = vpop.xlane.xlu1 %791 }
 0x78f   :  { %v794_v7 = vsub.f32 0.0, %v792_v46 }
 0x791   :  { %796 = vxpose.xlu1.b32.end [2/2] (short) (narrow) %v794_v7, 8  ;;  %1552 = vxpose.xlu0.b32.end [2/2] (short) (narrow) %v1550_v56, 8 }
 0x80d   :  { %v1567_v41 = vpop.trf.xlu0  ;;  %v811_v2 = vpop.trf.xlu1 }
 0x80e   :  { %v1584_v48 = vrot.slane %v1567_v41, 7 }
 0x810   :  { %v1587_v27 = vsel %vm1586_vm0, %v811_v2, %v1584_v48 }
 0x811   :  { %1589 = vst.msk [vmem:[%s2467_s8] sm:$0x3] %vm1588_vm1, %v1587_v27 }

</bundles_post_ra>
